<compile_context>
chip_gen: v6e
topology: v6e:2x2x1
jax: 0.10.0
libtpu: 0.0.40
codegen_flags: <defaults>
</compile_context>

<pallas_src>
import functools
import numpy as np
import jax
import jax.numpy as jnp
from jax import lax
from jax.experimental import pallas as pl
from jax.experimental.pallas import tpu as pltpu

# ---- module configuration: DynaRandGrads(lat_size=32, channels=4,
#      kernel_sizes=3, paddings=1, dim=2, n_calls=1, mode='split_out',
#      ind_chan=False, lat_factor=1) ----
LAT = 32
C = 4
KH = KW = 3
P = KH * KW                      # 9 taps
PAD = 1
N_CALLS = 1
K_SIZE = C * C * P               # 144
OUT_DIM = K_SIZE + C             # 148
H1 = int(LAT * 1)                # lat_factor = 1
H2 = LAT * 2                     # fhidden of second residual block
PREC = jax.lax.Precision.HIGHEST

# packed parameter slab geometry (one weight slab + one bias slab -> 2 DMAs).
# The [activation | shortcut] column split is 128-lane aligned (review item).
SC = 128                                          # shortcut column offset
W_ROWS = LAT + H1 + H1 + H2                       # 160
W_COLS = 384                                      # >= SC + OUT_DIM = 276, lane aligned
RW1, RW1B, RW2, RW2B = 0, LAT, LAT + H1, LAT + 2 * H1


def _leaky_relu(v):
    return jnp.where(v > 0, v, 0.2 * v)


# --------------------------------------------------------------------------
# Fused Pallas kernel (per-sample grid step):
#   dyna_k MLP (4 MXU matmuls)  +  grouped 3x3 conv (4 MXU matmuls)  +  split_out
# --------------------------------------------------------------------------
def _dyna_fused_kernel(x_ref, lat_ref, w_ref, b_ref, mask_ref, o_ref, *, wsp, hw):
    f32 = jnp.float32

    # -------- 1) dyna_k MLP: two LinearResidualBlocks, combined [act|shortcut]
    #             matmuls with 128-aligned split points --------
    lat = lat_ref[...]                                                    # (1, 32)
    t1 = (jnp.dot(lat, w_ref[RW1:RW1 + LAT, 0:SC + H1],
                  preferred_element_type=f32, precision=PREC)
          + b_ref[0:1, 0:SC + H1])                                        # (1, 160)
    hid1 = _leaky_relu(t1[:, 0:H1])
    res1 = (t1[:, SC:SC + H1]
            + jnp.dot(hid1, w_ref[RW1B:RW1B + H1, 0:H1],
                      preferred_element_type=f32, precision=PREC)
            + b_ref[1:2, 0:H1])                                           # (1, 32)
    t2 = (jnp.dot(res1, w_ref[RW2:RW2 + H1, 0:SC + OUT_DIM],
                  preferred_element_type=f32, precision=PREC)
          + b_ref[2:3, 0:SC + OUT_DIM])                                   # (1, 276)
    hid2 = _leaky_relu(t2[:, 0:H2])
    kc = (t2[:, SC:SC + OUT_DIM]
          + jnp.dot(hid2, w_ref[RW2B:RW2B + H2, 0:OUT_DIM],
                    preferred_element_type=f32, precision=PREC)
          + b_ref[3:4, 0:OUT_DIM])                                        # (1, 148)
    # kc's k-part columns were permuted offline to (out_ch, tap, in_ch) order,
    # so kc[:, o*36:(o+1)*36] is directly the conv weight row for output ch o.
    # theta_scale == 0 (n_calls == 1): the rotation is the identity -> no
    # cos/sin / bilinear resampling needed (static specialization).

    # -------- 2) tap-shifted views of x: one zero-padded slab + 9 static slices
    x = x_ref[...]                                                        # (C, hw)
    zpad = jnp.zeros((C, wsp + 1), f32)
    xpad = jnp.concatenate([zpad, x, zpad], axis=1)                       # (C, hw + 2*(wsp+1))
    taps = []
    for p_ in range(P):
        off = (p_ // KW - PAD) * wsp + (p_ % KW - PAD)
        s = wsp + 1 + off
        taps.append(xpad[:, s:s + hw])                                    # (C, hw)
    # rows ordered (tap p, in_ch c); one multiply applies all border masks
    xd = jnp.concatenate(taps, axis=0) * mask_ref[...]                    # (C*P, hw)

    # -------- 3) grouped conv on the MXU: contract the joint (tap, in_ch) axis
    rows = [jnp.dot(kc[:, o * C * P:(o + 1) * C * P], xd,
                    preferred_element_type=f32, precision=PREC)
            for o in range(C)]                                            # C x (1, hw)

    # -------- 4) mode='split_out': direct lane-dense sub-stores of [x, conv(x)]
    o_ref[0:C, :] = x
    o_ref[C:2 * C, :] = jnp.concatenate(rows, axis=0)


# --------------------------------------------------------------------------
# Precomputed border-validity masks (passed as an input, not captured)
# --------------------------------------------------------------------------
@functools.lru_cache(maxsize=None)
def _tap_masks(h, w):
    hw = h * w
    rows = np.arange(hw) // w
    cols = np.arange(hw) % w
    m = np.zeros((P * C, hw), np.float32)
    for p_ in range(P):
        dh, dw = p_ // KW - PAD, p_ % KW - PAD
        valid = ((rows + dh >= 0) & (rows + dh < h)
                 & (cols + dw >= 0) & (cols + dw < w)).astype(np.float32)
        m[p_ * C:(p_ + 1) * C, :] = valid[None, :]
    return jnp.asarray(m)


# --------------------------------------------------------------------------
# Wrapper: batch-parallel grid (v7x uses both TensorCores), resident params
# --------------------------------------------------------------------------
def dyna_rand_grads_forward(x, lat, packed, call_c=1):
    b, c, h, w = x.shape
    assert c == C and KH == 2 * PAD + 1
    theta_scale = float(call_c % N_CALLS)
    if theta_scale != 0.0:
        # TODO(synk): rotation path for n_calls > 1 not implemented in the kernel.
        raise NotImplementedError("n_calls > 1 rotation path not implemented")
    hw = h * w
    masks = _tap_masks(h, w)
    kern = functools.partial(_dyna_fused_kernel, wsp=w, hw=hw)
    out = pl.pallas_call(
        kern,
        out_shape=jax.ShapeDtypeStruct((b, 2 * C, hw), jnp.float32),
        grid=(b,),
        in_specs=[
            pl.BlockSpec((None, C, hw), lambda i: (i, 0, 0)),      # x (per sample)
            pl.BlockSpec((None, 1, LAT), lambda i: (i, 0, 0)),     # lat (per sample)
            pl.BlockSpec((W_ROWS, W_COLS), lambda i: (0, 0)),      # weight slab (resident)
            pl.BlockSpec((4, W_COLS), lambda i: (0, 0)),           # bias slab (resident)
            pl.BlockSpec((C * P, hw), lambda i: (0, 0)),           # tap masks (resident)
        ],
        out_specs=pl.BlockSpec((None, 2 * C, hw), lambda i: (i, 0, 0)),
        compiler_params=pltpu.CompilerParams(
            dimension_semantics=("parallel",)),
    )(x.reshape(b, C, hw), lat.reshape(b, 1, LAT),
      packed['w'], packed['b'], masks)
    return out.reshape(b, 2 * C, h, w)


# --------------------------------------------------------------------------
# One-time parameter packing (weight slab + bias slab -> 2 kernel inputs).
# Final-layer k-part columns are permuted from (o, c, p) to (o, p, c) so the
# kernel needs no in-kernel rearrangement.
# --------------------------------------------------------------------------
def _k_col_perm():
    perm = np.arange(OUT_DIM)
    for o in range(C):
        for p_ in range(P):
            for c in range(C):
                perm[o * C * P + p_ * C + c] = o * C * P + c * P + p_
    return perm


def pack_params(p):
    perm = _k_col_perm()
    w2s = jnp.asarray(p['w2s'])[:, perm]
    b2s = jnp.asarray(p['b2s'])[:, perm]
    w2b = jnp.asarray(p['w2b'])[:, perm]
    b2b = jnp.asarray(p['b2b'])[:, perm]

    wslab = jnp.zeros((W_ROWS, W_COLS), jnp.float32)
    wslab = wslab.at[RW1:RW1 + LAT, 0:H1].set(p['w1a'])
    wslab = wslab.at[RW1:RW1 + LAT, SC:SC + H1].set(p['w1s'])
    wslab = wslab.at[RW1B:RW1B + H1, 0:H1].set(p['w1b'])
    wslab = wslab.at[RW2:RW2 + H1, 0:H2].set(p['w2a'])
    wslab = wslab.at[RW2:RW2 + H1, SC:SC + OUT_DIM].set(w2s)
    wslab = wslab.at[RW2B:RW2B + H2, 0:OUT_DIM].set(w2b)

    bslab = jnp.zeros((4, W_COLS), jnp.float32)
    bslab = bslab.at[0, 0:H1].set(p['b1a'][0])
    bslab = bslab.at[0, SC:SC + H1].set(p['b1s'][0])
    bslab = bslab.at[1, 0:H1].set(p['b1b'][0])
    bslab = bslab.at[2, 0:H2].set(p['b2a'][0])
    bslab = bslab.at[2, SC:SC + OUT_DIM].set(b2s[0])
    bslab = bslab.at[3, 0:OUT_DIM].set(b2b[0])
    return {'w': wslab, 'b': bslab}


# --------------------------------------------------------------------------
# Pure-JAX reference (independent math path, un-permuted raw params)
# --------------------------------------------------------------------------
def make_sampling_matrix(theta, kh, kw):
    n = theta.shape[0]
    p = kh * kw
    xs = (2.0 * jnp.arange(kw, dtype=jnp.float32) + 1.0) / kw - 1.0
    ys = (2.0 * jnp.arange(kh, dtype=jnp.float32) + 1.0) / kh - 1.0
    cth = jnp.cos(theta)[:, None, None]
    sth = jnp.sin(theta)[:, None, None]
    X = xs[None, None, :]
    Y = ys[None, :, None]
    gx = cth * X - sth * Y
    gy = sth * X + cth * Y
    ix = ((gx + 1.0) * kw - 1.0) / 2.0
    iy = ((gy + 1.0) * kh - 1.0) / 2.0
    x0 = jnp.floor(ix)
    y0 = jnp.floor(iy)
    x1 = x0 + 1.0
    y1 = y0 + 1.0
    wx1 = ix - x0
    wx0 = 1.0 - wx1
    wy1 = iy - y0
    wy0 = 1.0 - wy1

    def corner(xc, yc, wgt):
        valid = ((xc >= 0) & (xc <= kw - 1) & (yc >= 0) & (yc <= kh - 1))
        valid = valid.astype(jnp.float32)
        xi = jnp.clip(xc, 0, kw - 1).astype(jnp.int32)
        yi = jnp.clip(yc, 0, kh - 1).astype(jnp.int32)
        q = yi * kw + xi
        onehot = jax.nn.one_hot(q, p, dtype=jnp.float32)
        return (wgt * valid)[..., None] * onehot

    smat = (corner(x0, y0, wx0 * wy0) + corner(x1, y0, wx1 * wy0)
            + corner(x0, y1, wx0 * wy1) + corner(x1, y1, wx1 * wy1))
    return smat.reshape(n, p, p)                 # (n, target p, source q)


def reference_forward(x, lat, p, call_c=1):
    def lrelu(v):
        return jnp.where(v > 0, v, 0.2 * v)
    h = lrelu(jnp.dot(lat, p['w1a'], precision=PREC) + p['b1a'])
    r1 = (jnp.dot(lat, p['w1s'], precision=PREC) + p['b1s']
          + jnp.dot(h, p['w1b'], precision=PREC) + p['b1b'])
    h2 = lrelu(jnp.dot(r1, p['w2a'], precision=PREC) + p['b2a'])
    kc = (jnp.dot(r1, p['w2s'], precision=PREC) + p['b2s']
          + jnp.dot(h2, p['w2b'], precision=PREC) + p['b2b'])
    b, cc, hh, ww = x.shape
    k = kc[:, :K_SIZE].reshape(b * C, C, P)
    theta = kc[:, K_SIZE:].reshape(b * C) * float(call_c % N_CALLS)
    smat = make_sampling_matrix(theta, KH, KW)
    rot = jnp.einsum('npq,ncq->ncp', smat, k).reshape(b * C, C, KH, KW)
    xr = x.reshape(1, b * C, hh, ww)
    y = lax.conv_general_dilated(
        xr, rot, window_strides=(1, 1), padding=((PAD, PAD), (PAD, PAD)),
        dimension_numbers=('NCHW', 'OIHW', 'NCHW'),
        feature_group_count=b, precision=PREC)
    y = y.reshape(b, C, hh, ww)
    return jnp.concatenate([x, y], axis=1)


# --------------------------------------------------------------------------
# Deterministic parameter init (synthetic; shapes follow the module __init__)
# --------------------------------------------------------------------------
def init_params(key):
    keys = jax.random.split(key, 7)

    def lin_w(k, fin, fout):
        bound = 1.0 / np.sqrt(fin)
        return jax.random.uniform(k, (fin, fout), jnp.float32, -bound, bound)

    p = {
        'w1a': lin_w(keys[0], LAT, H1), 'b1a': jnp.zeros((1, H1), jnp.float32),
        'w1b': lin_w(keys[1], H1, H1),  'b1b': jnp.zeros((1, H1), jnp.float32),
        'w1s': lin_w(keys[2], LAT, H1), 'b1s': jnp.zeros((1, H1), jnp.float32),
        'w2a': lin_w(keys[3], H1, H2),  'b2a': jnp.zeros((1, H2), jnp.float32),
        'w2b': lin_w(keys[4], H2, OUT_DIM), 'b2b': jnp.zeros((1, OUT_DIM), jnp.float32),
        'w2s': lin_w(keys[5], H1, OUT_DIM),
    }
    # s_bias: zeros for the weight part, randn * (1/n_calls) * pi for the theta part
    s_bias = jnp.zeros((OUT_DIM,), jnp.float32)
    s_bias = s_bias.at[K_SIZE:].set(
        jax.random.normal(keys[6], (C,), jnp.float32) * (1.0 / N_CALLS) * np.pi)
    p['b2s'] = s_bias.reshape(1, OUT_DIM)
    return p


if __name__ == "__main__":
    key = jax.random.PRNGKey(0)
    kx, kl, kp = jax.random.split(key, 3)
    B, Hsp, Wsp = 2, 16, 16
    x = jax.random.normal(kx, (B, C, Hsp, Wsp), jnp.float32)
    lat = jax.random.normal(kl, (B, LAT), jnp.float32)
    raw_params = init_params(kp)
    packed = pack_params(raw_params)

    out = dyna_rand_grads_forward(x, lat, packed, call_c=1)
    out = jax.block_until_ready(out)
    assert out.shape == (B, 2 * C, Hsp, Wsp), out.shape

    ref = reference_forward(x, lat, raw_params, call_c=1)
    ref = jax.block_until_ready(ref)
    np.testing.assert_allclose(np.asarray(out), np.asarray(ref),
                               rtol=5e-4, atol=5e-4)
    print("KERNEL_OK")
</pallas_src>

<mosaic_0001>
module attributes {stable_mosaic.version = 11 : i64} {
  func.func @_dyna_fused_kernel(%arg0: i32, %arg1: memref<1x4x256xf32, #tpu.memory_space<vmem>>, %arg2: memref<1x1x32xf32, #tpu.memory_space<vmem>>, %arg3: memref<160x384xf32, #tpu.memory_space<vmem>>, %arg4: memref<4x384xf32, #tpu.memory_space<vmem>>, %arg5: memref<36x256xf32, #tpu.memory_space<vmem>>, %arg6: memref<1x8x256xf32, #tpu.memory_space<vmem>>) attributes {dimension_semantics = [#tpu.dimension_semantics<parallel>], iteration_bounds = array<i64: 2>, scalar_prefetch = 0 : i64, scratch_operands = 0 : i64, tpu.core_type = #tpu.core_type<tc>, window_params = [{transform_indices = @transform_0, window_bounds = array<i64: 1, 4, 256>}, {transform_indices = @transform_1, window_bounds = array<i64: 1, 1, 32>}, {pipeline_mode = #tpu.pipeline_mode<synchronous>, transform_indices = @transform_2, window_bounds = array<i64: 160, 384>}, {pipeline_mode = #tpu.pipeline_mode<synchronous>, transform_indices = @transform_3, window_bounds = array<i64: 4, 384>}, {pipeline_mode = #tpu.pipeline_mode<synchronous>, transform_indices = @transform_4, window_bounds = array<i64: 36, 256>}, {transform_indices = @transform_5, window_bounds = array<i64: 1, 8, 256>}]} {
    %c0 = arith.constant 0 : index
    %c0_0 = arith.constant 0 : index
    %c0_1 = arith.constant 0 : index
    %0 = vector.load %arg2[%c0, %c0_0, %c0_1] : memref<1x1x32xf32, #tpu.memory_space<vmem>>, vector<1x1x32xf32>
    %1 = vector.shape_cast %0 : vector<1x1x32xf32> to vector<1x32xf32>
    %c0_2 = arith.constant 0 : index
    %c0_3 = arith.constant 0 : index
    %2 = vector.load %arg3[%c0_2, %c0_3] : memref<160x384xf32, #tpu.memory_space<vmem>>, vector<32x160xf32>
    %cst = arith.constant dense<0.000000e+00> : vector<1x160xf32>
    %3 = tpu.matmul %1, %2, %cst {dimension_numbers = #tpu.dot_dimension_numbers<[1], [0], [0], [1], [0, 0, 1, 1], [], []>, precision = #tpu.contract_precision<fp32>} : vector<1x32xf32>, vector<32x160xf32>, vector<1x160xf32> -> vector<1x160xf32>
    %c0_4 = arith.constant 0 : index
    %c0_5 = arith.constant 0 : index
    %4 = vector.load %arg4[%c0_4, %c0_5] : memref<4x384xf32, #tpu.memory_space<vmem>>, vector<1x160xf32>
    %5 = arith.addf %3, %4 : vector<1x160xf32>
    %6 = vector.extract_strided_slice %5 {offsets = [0, 0], sizes = [1, 32], strides = [1, 1]} : vector<1x160xf32> to vector<1x32xf32>
    %cst_6 = arith.constant 0.000000e+00 : f32
    %7 = vector.broadcast %cst_6 : f32 to vector<1x32xf32>
    %8 = arith.cmpf ogt, %6, %7 : vector<1x32xf32>
    %cst_7 = arith.constant 2.000000e-01 : f32
    %9 = vector.broadcast %cst_7 : f32 to vector<1x32xf32>
    %10 = arith.mulf %9, %6 : vector<1x32xf32>
    %11 = arith.select %8, %6, %10 : vector<1x32xi1>, vector<1x32xf32>
    %12 = vector.extract_strided_slice %5 {offsets = [0, 128], sizes = [1, 32], strides = [1, 1]} : vector<1x160xf32> to vector<1x32xf32>
    %c32 = arith.constant 32 : index
    %c0_8 = arith.constant 0 : index
    %13 = vector.load %arg3[%c32, %c0_8] : memref<160x384xf32, #tpu.memory_space<vmem>>, vector<32x32xf32>
    %cst_9 = arith.constant dense<0.000000e+00> : vector<1x32xf32>
    %14 = tpu.matmul %11, %13, %cst_9 {dimension_numbers = #tpu.dot_dimension_numbers<[1], [0], [0], [1], [0, 0, 1, 1], [], []>, precision = #tpu.contract_precision<fp32>} : vector<1x32xf32>, vector<32x32xf32>, vector<1x32xf32> -> vector<1x32xf32>
    %15 = arith.addf %12, %14 : vector<1x32xf32>
    %c1 = arith.constant 1 : index
    %c0_10 = arith.constant 0 : index
    %16 = vector.load %arg4[%c1, %c0_10] : memref<4x384xf32, #tpu.memory_space<vmem>>, vector<1x32xf32>
    %17 = arith.addf %15, %16 : vector<1x32xf32>
    %c64 = arith.constant 64 : index
    %c0_11 = arith.constant 0 : index
    %18 = vector.load %arg3[%c64, %c0_11] : memref<160x384xf32, #tpu.memory_space<vmem>>, vector<32x276xf32>
    %cst_12 = arith.constant dense<0.000000e+00> : vector<1x276xf32>
    %19 = tpu.matmul %17, %18, %cst_12 {dimension_numbers = #tpu.dot_dimension_numbers<[1], [0], [0], [1], [0, 0, 1, 1], [], []>, precision = #tpu.contract_precision<fp32>} : vector<1x32xf32>, vector<32x276xf32>, vector<1x276xf32> -> vector<1x276xf32>
    %c2 = arith.constant 2 : index
    %c0_13 = arith.constant 0 : index
    %20 = vector.load %arg4[%c2, %c0_13] : memref<4x384xf32, #tpu.memory_space<vmem>>, vector<1x276xf32>
    %21 = arith.addf %19, %20 : vector<1x276xf32>
    %22 = vector.extract_strided_slice %21 {offsets = [0, 0], sizes = [1, 64], strides = [1, 1]} : vector<1x276xf32> to vector<1x64xf32>
    %cst_14 = arith.constant 0.000000e+00 : f32
    %23 = vector.broadcast %cst_14 : f32 to vector<1x64xf32>
    %24 = arith.cmpf ogt, %22, %23 : vector<1x64xf32>
    %cst_15 = arith.constant 2.000000e-01 : f32
    %25 = vector.broadcast %cst_15 : f32 to vector<1x64xf32>
    %26 = arith.mulf %25, %22 : vector<1x64xf32>
    %27 = arith.select %24, %22, %26 : vector<1x64xi1>, vector<1x64xf32>
    %28 = vector.extract_strided_slice %21 {offsets = [0, 128], sizes = [1, 148], strides = [1, 1]} : vector<1x276xf32> to vector<1x148xf32>
    %c96 = arith.constant 96 : index
    %c0_16 = arith.constant 0 : index
    %29 = vector.load %arg3[%c96, %c0_16] : memref<160x384xf32, #tpu.memory_space<vmem>>, vector<64x148xf32>
    %cst_17 = arith.constant dense<0.000000e+00> : vector<1x148xf32>
    %30 = tpu.matmul %27, %29, %cst_17 {dimension_numbers = #tpu.dot_dimension_numbers<[1], [0], [0], [1], [0, 0, 1, 1], [], []>, precision = #tpu.contract_precision<fp32>} : vector<1x64xf32>, vector<64x148xf32>, vector<1x148xf32> -> vector<1x148xf32>
    %31 = arith.addf %28, %30 : vector<1x148xf32>
    %c3 = arith.constant 3 : index
    %c0_18 = arith.constant 0 : index
    %32 = vector.load %arg4[%c3, %c0_18] : memref<4x384xf32, #tpu.memory_space<vmem>>, vector<1x148xf32>
    %33 = arith.addf %31, %32 : vector<1x148xf32>
    %c0_19 = arith.constant 0 : index
    %c0_20 = arith.constant 0 : index
    %c0_21 = arith.constant 0 : index
    %34 = vector.load %arg1[%c0_19, %c0_20, %c0_21] : memref<1x4x256xf32, #tpu.memory_space<vmem>>, vector<1x4x256xf32>
    %35 = vector.shape_cast %34 : vector<1x4x256xf32> to vector<4x256xf32>
    %cst_22 = arith.constant 0.000000e+00 : f32
    %36 = vector.broadcast %cst_22 : f32 to vector<4x17xf32>
    %37 = tpu.concatenate %36, %35, %36 in 1 : vector<4x17xf32>, vector<4x256xf32>, vector<4x17xf32> -> vector<4x290xf32>
    %38 = vector.extract_strided_slice %37 {offsets = [0, 0], sizes = [4, 256], strides = [1, 1]} : vector<4x290xf32> to vector<4x256xf32>
    %39 = vector.extract_strided_slice %37 {offsets = [0, 1], sizes = [4, 256], strides = [1, 1]} : vector<4x290xf32> to vector<4x256xf32>
    %40 = vector.extract_strided_slice %37 {offsets = [0, 2], sizes = [4, 256], strides = [1, 1]} : vector<4x290xf32> to vector<4x256xf32>
    %41 = vector.extract_strided_slice %37 {offsets = [0, 16], sizes = [4, 256], strides = [1, 1]} : vector<4x290xf32> to vector<4x256xf32>
    %42 = vector.extract_strided_slice %37 {offsets = [0, 17], sizes = [4, 256], strides = [1, 1]} : vector<4x290xf32> to vector<4x256xf32>
    %43 = vector.extract_strided_slice %37 {offsets = [0, 18], sizes = [4, 256], strides = [1, 1]} : vector<4x290xf32> to vector<4x256xf32>
    %44 = vector.extract_strided_slice %37 {offsets = [0, 32], sizes = [4, 256], strides = [1, 1]} : vector<4x290xf32> to vector<4x256xf32>
    %45 = vector.extract_strided_slice %37 {offsets = [0, 33], sizes = [4, 256], strides = [1, 1]} : vector<4x290xf32> to vector<4x256xf32>
    %46 = vector.extract_strided_slice %37 {offsets = [0, 34], sizes = [4, 256], strides = [1, 1]} : vector<4x290xf32> to vector<4x256xf32>
    %47 = tpu.concatenate %38, %39, %40, %41, %42, %43, %44, %45, %46 in 0 : vector<4x256xf32>, vector<4x256xf32>, vector<4x256xf32>, vector<4x256xf32>, vector<4x256xf32>, vector<4x256xf32>, vector<4x256xf32>, vector<4x256xf32>, vector<4x256xf32> -> vector<36x256xf32>
    %c0_23 = arith.constant 0 : index
    %c0_24 = arith.constant 0 : index
    %48 = vector.load %arg5[%c0_23, %c0_24] : memref<36x256xf32, #tpu.memory_space<vmem>>, vector<36x256xf32>
    %49 = arith.mulf %47, %48 : vector<36x256xf32>
    %50 = vector.extract_strided_slice %33 {offsets = [0, 0], sizes = [1, 36], strides = [1, 1]} : vector<1x148xf32> to vector<1x36xf32>
    %cst_25 = arith.constant dense<0.000000e+00> : vector<1x256xf32>
    %51 = tpu.matmul %50, %49, %cst_25 {dimension_numbers = #tpu.dot_dimension_numbers<[1], [0], [0], [1], [0, 0, 1, 1], [], []>, precision = #tpu.contract_precision<fp32>} : vector<1x36xf32>, vector<36x256xf32>, vector<1x256xf32> -> vector<1x256xf32>
    %52 = vector.extract_strided_slice %33 {offsets = [0, 36], sizes = [1, 36], strides = [1, 1]} : vector<1x148xf32> to vector<1x36xf32>
    %cst_26 = arith.constant dense<0.000000e+00> : vector<1x256xf32>
    %53 = tpu.matmul %52, %49, %cst_26 {dimension_numbers = #tpu.dot_dimension_numbers<[1], [0], [0], [1], [0, 0, 1, 1], [], []>, precision = #tpu.contract_precision<fp32>} : vector<1x36xf32>, vector<36x256xf32>, vector<1x256xf32> -> vector<1x256xf32>
    %54 = vector.extract_strided_slice %33 {offsets = [0, 72], sizes = [1, 36], strides = [1, 1]} : vector<1x148xf32> to vector<1x36xf32>
    %cst_27 = arith.constant dense<0.000000e+00> : vector<1x256xf32>
    %55 = tpu.matmul %54, %49, %cst_27 {dimension_numbers = #tpu.dot_dimension_numbers<[1], [0], [0], [1], [0, 0, 1, 1], [], []>, precision = #tpu.contract_precision<fp32>} : vector<1x36xf32>, vector<36x256xf32>, vector<1x256xf32> -> vector<1x256xf32>
    %56 = vector.extract_strided_slice %33 {offsets = [0, 108], sizes = [1, 36], strides = [1, 1]} : vector<1x148xf32> to vector<1x36xf32>
    %cst_28 = arith.constant dense<0.000000e+00> : vector<1x256xf32>
    %57 = tpu.matmul %56, %49, %cst_28 {dimension_numbers = #tpu.dot_dimension_numbers<[1], [0], [0], [1], [0, 0, 1, 1], [], []>, precision = #tpu.contract_precision<fp32>} : vector<1x36xf32>, vector<36x256xf32>, vector<1x256xf32> -> vector<1x256xf32>
    %c0_29 = arith.constant 0 : index
    %c0_30 = arith.constant 0 : index
    %c0_31 = arith.constant 0 : index
    %58 = vector.load %arg6[%c0_29, %c0_30, %c0_31] : memref<1x8x256xf32, #tpu.memory_space<vmem>>, vector<1x4x256xf32>
    %59 = vector.shape_cast %58 : vector<1x4x256xf32> to vector<4x256xf32>
    %60 = vector.shape_cast %35 : vector<4x256xf32> to vector<1x4x256xf32>
    tpu.vector_store %arg6[%c0_29, %c0_30, %c0_31], %60 {strides = array<i32>} : memref<1x8x256xf32, #tpu.memory_space<vmem>>, vector<1x4x256xf32>,
    %61 = tpu.concatenate %51, %53, %55, %57 in 0 : vector<1x256xf32>, vector<1x256xf32>, vector<1x256xf32>, vector<1x256xf32> -> vector<4x256xf32>
    %c0_32 = arith.constant 0 : index
    %c4 = arith.constant 4 : index
    %c0_33 = arith.constant 0 : index
    %62 = vector.load %arg6[%c0_32, %c4, %c0_33] : memref<1x8x256xf32, #tpu.memory_space<vmem>>, vector<1x4x256xf32>
    %63 = vector.shape_cast %62 : vector<1x4x256xf32> to vector<4x256xf32>
    %64 = vector.shape_cast %61 : vector<4x256xf32> to vector<1x4x256xf32>
    tpu.vector_store %arg6[%c0_32, %c4, %c0_33], %64 {strides = array<i32>} : memref<1x8x256xf32, #tpu.memory_space<vmem>>, vector<1x4x256xf32>,
    return
  }
  func.func @transform_0(%arg0: i32) -> (i32, i32, i32) {
    %c0_i32 = arith.constant 0 : i32
    %c0_i32_0 = arith.constant 0 : i32
    %c0_i32_1 = arith.constant 0 : i32
    return %arg0, %c0_i32, %c0_i32_0 : i32, i32, i32
  }
  func.func @transform_1(%arg0: i32) -> (i32, i32, i32) {
    %c0_i32 = arith.constant 0 : i32
    %c0_i32_0 = arith.constant 0 : i32
    %c0_i32_1 = arith.constant 0 : i32
    return %arg0, %c0_i32, %c0_i32_0 : i32, i32, i32
  }
  func.func @transform_2(%arg0: i32) -> (i32, i32) {
    %c0_i32 = arith.constant 0 : i32
    %c0_i32_0 = arith.constant 0 : i32
    %c0_i32_1 = arith.constant 0 : i32
    return %c0_i32, %c0_i32_0 : i32, i32
  }
  func.func @transform_3(%arg0: i32) -> (i32, i32) {
    %c0_i32 = arith.constant 0 : i32
    %c0_i32_0 = arith.constant 0 : i32
    %c0_i32_1 = arith.constant 0 : i32
    return %c0_i32, %c0_i32_0 : i32, i32
  }
  func.func @transform_4(%arg0: i32) -> (i32, i32) {
    %c0_i32 = arith.constant 0 : i32
    %c0_i32_0 = arith.constant 0 : i32
    %c0_i32_1 = arith.constant 0 : i32
    return %c0_i32, %c0_i32_0 : i32, i32
  }
  func.func @transform_5(%arg0: i32) -> (i32, i32, i32) {
    %c0_i32 = arith.constant 0 : i32
    %c0_i32_0 = arith.constant 0 : i32
    %c0_i32_1 = arith.constant 0 : i32
    return %arg0, %c0_i32, %c0_i32_0 : i32, i32, i32
  }
}

</mosaic_0001>

<bundles_post_ra>
// kernel: tpu_custom_call.1
= control target key start
LH: loop header
LB: loop body
LE: loop exit
PB: predicated region body
PF: predicated region fallthrough
CT: control target
= control target key end

     0   :  { %10 = vsyncpa [#allocation3], 0  ;;  %s7789_s0 = inlined_call_operand.hbm [shape: f32[2,4,256], index: 0, kind: input, shape index: {}]   ;;  %s7790_s1 = inlined_call_operand.hbm [shape: f32[2,1,32], index: 1, kind: input, shape index: {}]   ;;  %s7791_s2 = inlined_call_operand.hbm [shape: f32[160,384], index: 2, kind: input, shape index: {}]   ;;  %s7792_s3 = inlined_call_operand.hbm [shape: f32[4,384], index: 3, kind: input, shape index: {}]   ;;  %s7793_s4 = inlined_call_operand.hbm [shape: f32[36,256], index: 4, kind: input, shape index: {}]   ;;  %s7794_s5 = inlined_call_operand.hbm [shape: f32[2,8,256], index: 5, kind: output, shape index: {}]  }
   0x1   :  { %12 = vsyncpa [#allocation3 + $0x1], 0 }
   0x2   :  { %13 = vsyncpa [#allocation6], 0 }
   0x3   :  { %15 = vsyncpa [#allocation6 + $0x1], 0 }
   0x4   :  { %16 = vsyncpa [#allocation9], 0 }
   0x5   :  { %17 = vsyncpa [#allocation4], 0 }
   0x6   :  { %19 = vsyncpa [#allocation4 + $0x1], 0  ;;  %s6322_s18 = smov 0   ;;  %s6324_s19 = smov 0  }
   0x7   :  { %s6326_s20 = smov 0   ;;  %s6328_s21 = smov 0  }
   0x8 LB: > { %s6343_s22 = sadd.s32 4294967295, %s6266_s21   ;;  %s5740_s23 = sadd.s32 4294967294, %s6266_s21   ;;  %s6266_s21 = sphi %s6328_s21, %s7874_s21   ;;  %s6262_s20 = sphi %s6326_s20, %s7873_s20   ;;  %s6258_s19 = sphi %s6324_s19, %s7872_s19   ;;  %s6254_s18 = sphi %s6322_s18, %s7871_s18  }
   0x9   : > { %p45_p0 = scmp.ne.s32.totalorder %s6258_s19, %s6254_s18  ;;  %p7795_p1 = scmp.eq.s32.totalorder %s6343_s22, 0 }
   0xa   : > { %p164_p3 = scmp.eq.s32.totalorder %s5740_s23, 1  ;;  %p5741_p5 = scmp.ge.s32.totalorder %s6266_s21, 1 }
   0xb   : > { %p6352_p4 = por %p7795_p1, %p45_p0  ;;  %p171_p7 = scmp.lt.s32.totalorder %s6266_s21, 3 }
   0xc   : > { %p6357_p6 = por %p164_p3, %p45_p0  ;;  %s6268_s27 = smov [#allocation7]  }
   0xd   : > { %s7825_s24 = scalar_select %p6352_p4, 1, 0 }
   0xe   : > { %s7826_s25 = scalar_select %p6357_p6, 1, 0 }
   0xf   : > { %p6362_p8 = pnand %p5741_p5, %p171_p7  ;;  %s183_s28 = sshll.u32 %s6268_s27, 4  ;;  %s184_s28 = int_to_ptr.vmem [resolvable:$true] %s183_s28 }
  0x10   : > { %s6269_s30 = smov [#allocation8]   ;;  %s6270_s7 = smov [#allocation10]  }
  0x11   : > { %s7827_s26 = scalar_select %p6362_p8, 1, 0 }
  0x12   : > { %p5973_p9 = pneg %p6362_p8  ;;  %s197_s6 = sshll.u32 %s6269_s30, 4  ;;  %s198_s6 = int_to_ptr.vmem [resolvable:$true] %s197_s6 }
  0x13   : > { %s207_s8 = sshll.u32 %s6270_s7, 4  ;;  %s6067_s9 = scalar_lea.vmem %s184_s28, 7680  ;;  %s208_s8 = int_to_ptr.vmem [resolvable:$true] %s207_s8 }
  0x14   : > { %p6371_p11 = pnand %p5973_p9, %p7795_p1  ;;  %p6068_p13 = scmp.ne.s32.totalorder %s184_s28, %s6067_s9 }
  0x15   : > { %p6075_p5 = scmp.lt.s32.totalorder %s184_s28, %s184_s28  ;;  %p6076_p7 = scmp.lt.s32.totalorder %s6067_s9, %s6067_s9 }
  0x16   : > { %p6058_p12 = pneg %p6371_p11 }
  0x17   : > { %p6077_p9 = por %p6076_p7, %p6075_p5 }
  0x18   : > { %p6070_p0 = pnand %p6068_p13, %p6058_p12 }
  0x1a   : > { %p6071_p3 = pneg %p6070_p0 }
  0x1c   : > { %p6078_p10 = pnand %p6077_p9, %p6071_p3 }
  0x1e   : > { %6081 = shalt.err (!%p6078_p10)
}
  0x1f   : > { %s6271_s10 = smov 384   ;;  %s6272_s11 = smov 24  }
  0x20   : > { %5976 = dma.hbm_to_vmem [thread:$0]  (!%p6371_p11), %s7791_s2, 7680, %s184_s28, [#allocation6], %s6271_s10, %s6271_s10, %s6272_s11  }
  0x21   : > { %s6093_s14 = scalar_lea.vmem %s198_s6, 192  ;;  %p6101_p2 = scmp.lt.s32.totalorder %s198_s6, %s198_s6 }
  0x22   : > { %p6094_p1 = scmp.ne.s32.totalorder %s198_s6, %s6093_s14  ;;  %p6102_p6 = scmp.lt.s32.totalorder %s6093_s14, %s6093_s14 }
  0x24   : > { %p6096_p13 = pnand %p6094_p1, %p6058_p12  ;;  %p6103_p5 = por %p6102_p6, %p6101_p2 }
  0x26   : > { %p6097_p0 = pneg %p6096_p13 }
  0x28   : > { %p6104_p3 = pnand %p6103_p5, %p6097_p0 }
  0x2a   : > { %6107 = shalt.err (!%p6104_p3)
}
  0x2b   : > { %5979 = dma.hbm_to_vmem [thread:$0]  (!%p6371_p11), %s7792_s3, 192, %s198_s6, [#allocation9]  }
  0x2c   : > { %s6119_s17 = scalar_lea.vmem %s208_s8, 1280  ;;  %p6127_p9 = scmp.lt.s32.totalorder %s208_s8, %s208_s8 }
  0x2d   : > { %p6120_p10 = scmp.ne.s32.totalorder %s208_s8, %s6119_s17  ;;  %p6128_p13 = scmp.lt.s32.totalorder %s6119_s17, %s6119_s17 }
  0x2f   : > { %p6122_p7 = pnand %p6120_p10, %p6058_p12  ;;  %p6129_p4 = por %p6128_p13, %p6127_p9 }
  0x31   : > { %p6123_p1 = pneg %p6122_p7 }
  0x33   : > { %p6130_p2 = pnand %p6129_p4, %p6123_p1 }
  0x35   : > { %6133 = shalt.err (!%p6130_p2)
}
  0x36   : > { %s6273_s23 = smov 256   ;;  %s6274_s27 = smov 16  }
  0x37   : > { %5982 = dma.hbm_to_vmem [thread:$0]  (!%p6371_p11), %s7793_s4, 1280, %s208_s8, [#allocation9], %s6273_s23, %s6273_s23, %s6274_s27  }
  0x38   : > { %s6402_s6 = sadd.s32 1, %s6266_s21   ;;  %s32_s9 = sadd.s32 1, %s6262_s20 }
  0x39   : > { %s29_s7 = ssub.s32 %s6266_s21, %s6402_s6  ;;  %p39_p6 = scmp.ne.s32.totalorder %s6262_s20, %s6258_s19 }
  0x3a   : > { %p30_p4 = scmp.eq.s32.totalorder %s29_s7, 0  ;;  %p40_p12 = scmp.eq.s32.totalorder %s6266_s21, 0 }
  0x3b   : > { %p5997_p0 = scmp.lt.s32.totalorder %s6266_s21, 2  ;;  %p7829_p3 = scmp.eq.s32.totalorder %s6343_s22, 1 }
  0x3c   : > { %s6412_s10 = scalar_select %p30_p4, %s6262_s20, %s32_s9  }
  0x3d   : > { %p41_p5 = por %p40_p12, %p39_p6  ;;  %p6416_p10 = por %p7829_p3, %p39_p6 }
  0x3e   : > { %s6421_s11 = sand.u32 1, %s6262_s20   ;;  %s5761_s8 = sshll.u32 %s6266_s21, 7 }
  0x3f   : > { %s7830_s29 = scalar_select %p6416_p10, 1, 0 }
  0x40   : > { %s5746_s12 = sshll.u32 %s6421_s11, 3  ;;  %s6428_s15 = scalar_lea.hbm %s7789_s0, %s5761_s8 }
  0x41   : > { %s225_s16 = scalar_lea.vmem [#allocation2], %s5746_s12  ;;  %p6430_p11 = pnand %p5997_p0, %p41_p5 }
  0x42   : > { %s233_s17 = sshll.u32 %s225_s16, 4  ;;  %s222_s28 = scalar_lea.sflag [#allocation3], %s6421_s11  ;;  %s234_s17 = int_to_ptr.vmem [resolvable:$true] %s233_s17 }
  0x43   : > { %s6134_s30 = scalar_lea.hbm %s6428_s15, 128  ;;  %p6136_p1 = pneg %p6430_p11 }
  0x44   : > { %p6135_p7 = scmp.ne.s32.totalorder %s6428_s15, %s6134_s30  ;;  %s6139_s8 = scalar_lea.hbm %s7789_s0, 256 }
  0x45   : > { %p6140_p2 = scmp.lt.s32.totalorder %s6428_s15, %s7789_s0  ;;  %p6141_p4 = scmp.lt.s32.totalorder %s6139_s8, %s6134_s30 }
  0x46   : > { %p6137_p9 = pnand %p6136_p1, %p6135_p7 }
  0x47   : > { %p6142_p6 = por %p6141_p4, %p6140_p2 }
  0x48   : > { %p6138_p13 = pneg %p6137_p9 }
  0x4a   : > { %p6143_p12 = pnand %p6142_p6, %p6138_p13 }
  0x4c   : > { %6146 = shalt.err (!%p6143_p12)
}
  0x4d   : > { %s6147_s14 = scalar_lea.vmem %s234_s17, 128  ;;  %s6275_s16 = smov [#allocation2]  }
  0x4e   : > { %p6148_p0 = scmp.ne.s32.totalorder %s234_s17, %s6147_s14  ;;  %s6152_s27 = sshll.u32 %s6275_s16, 4  ;;  %s6153_s27 = int_to_ptr.vmem [resolvable:$false] %s6152_s27 }
  0x4f   : > { %s6154_s7 = scalar_lea.vmem %s6153_s27, 256  ;;  %p6155_p7 = scmp.lt.s32.totalorder %s234_s17, %s6153_s27 }
  0x50   : > { %p6150_p5 = pnand %p6148_p0, %p6136_p1  ;;  %p6156_p9 = scmp.lt.s32.totalorder %s6154_s7, %s6147_s14 }
  0x52   : > { %p6151_p3 = pneg %p6150_p5  ;;  %p6157_p10 = por %p6156_p9, %p6155_p7 }
  0x54   : > { %p6158_p8 = pnand %p6157_p10, %p6151_p3 }
  0x56   : > { %6161 = shalt.err (!%p6158_p8)
}
  0x57   : > { %5986 = dma.hbm_to_vmem [thread:$0]  (!%p6430_p11), %s6428_s15, 128, %s234_s17, %s222_s28  }
  0x58   : > { %s5749_s30 = sshll.u32 %s6266_s21, 4  ;;  %s243_s27 = scalar_lea.vmem [#allocation5], %s6421_s11 }
  0x59   : > { %s6460_s12 = scalar_lea.hbm %s7790_s1, %s5749_s30  ;;  %s250_s13 = sshll.u32 %s243_s27, 4  ;;  %s251_s13 = int_to_ptr.vmem [resolvable:$true] %s250_s13 }
  0x5a   : > { %s7832_s14 = sand.u32 1, %s6266_s21   ;;  %s6162_s7 = scalar_lea.hbm %s6460_s12, 16 }
  0x5b   : > { %s241_s16 = scalar_lea.sflag [#allocation6], %s7832_s14  ;;  %p6163_p8 = scmp.ne.s32.totalorder %s6460_s12, %s6162_s7 }
  0x5c   : > { %s6167_s28 = scalar_lea.hbm %s7790_s1, 32  ;;  %p6168_p2 = scmp.lt.s32.totalorder %s6460_s12, %s7790_s1 }
  0x5d   : > { %p6165_p10 = pnand %p6163_p8, %p6136_p1  ;;  %p6169_p4 = scmp.lt.s32.totalorder %s6167_s28, %s6162_s7 }
  0x5f   : > { %p6166_p13 = pneg %p6165_p10  ;;  %p6170_p6 = por %p6169_p4, %p6168_p2 }
  0x61   : > { %p6171_p12 = pnand %p6170_p6, %p6166_p13 }
  0x63   : > { %6174 = shalt.err (!%p6171_p12)
}
  0x64   : > { %s6175_s11 = scalar_lea.vmem %s251_s13, 16  ;;  %s6276_s8 = smov [#allocation5]  }
  0x65   : > { %p6176_p0 = scmp.ne.s32.totalorder %s251_s13, %s6175_s11  ;;  %s6180_s27 = sshll.u32 %s6276_s8, 4  ;;  %s6181_s27 = int_to_ptr.vmem [resolvable:$false] %s6180_s27 }
  0x66   : > { %s6182_s14 = scalar_lea.vmem %s6181_s27, 32  ;;  %p6183_p7 = scmp.lt.s32.totalorder %s251_s13, %s6181_s27 }
  0x67   : > { %p6178_p5 = pnand %p6176_p0, %p6136_p1  ;;  %p6184_p9 = scmp.lt.s32.totalorder %s6182_s14, %s6175_s11 }
  0x69   : > { %p6179_p3 = pneg %p6178_p5  ;;  %p6185_p8 = por %p6184_p9, %p6183_p7 }
  0x6b   : > { %p6186_p10 = pnand %p6185_p8, %p6179_p3 }
  0x6d   : > { %6189 = shalt.err (!%p6186_p10)
}
  0x6e   : > { %5989 = dma.hbm_to_vmem [thread:$0]  (!%p6430_p11), %s6460_s12, 16, %s251_s13, %s241_s16  }
  0x6f   : > { %p7833_p13 = scmp.ne.s32.totalorder %s7827_s26, 0 }
  0x71   : > { %259 = sbr.rel (%p7833_p13) target bundleno = 1513 (0x5e9), region = 40 }
  0x76   : > { %s6486_s7 = sand.u32 1, %s6258_s19   ;;  %p7834_p1 = scmp.ne.s32.totalorder %s7825_s24, 0 }
  0x77   : > { %s5751_s15 = sshll.u32 %s6486_s7, 3  ;;  %s262_s17 = scalar_lea.sflag [#allocation3], %s6486_s7 }
  0x78   : > { %s6490_s28 = scalar_lea.vmem [#allocation2], %s5751_s15 }
  0x79   : > { %6233 = dma.done.wait (%p7834_p1), %s262_s17, 128  }
  0x7a   : > { %6235 = vsyncadd (%p7834_p1), %s262_s17, 4294967168  ;;  %s270_s26 = sand.u32 1, %s6343_s22   ;;  %s273_s12 = scalar_lea.vmem [#allocation5], %s6486_s7 }
  0x7b   : > { %s271_s23 = scalar_lea.sflag [#allocation6], %s270_s26 }
  0x7c   : > { %6237 = dma.done.wait (%p7834_p1), %s271_s23, 16  }
  0x7d   : > { %6239 = vsyncadd (%p7834_p1), %s271_s23, 4294967280  ;;  %p7835_p11 = scmp.eq.s32.totalorder %s6343_s22, 0 }
  0x7f   : > { %6241 = dma.done.wait (%p7835_p11), [#allocation6], 7680   ;;  %p7836_p2 = pmov %p7835_p11 }
  0x81   : > { %6243 = vsyncadd (%p7836_p2), [#allocation6], 4294959616  ;;  %p7837_p4 = pmov %p7836_p2 }
  0x82   : > { %p7838_p6 = pmov %p7836_p2 }
  0x83   : > { %6245 = dma.done.wait (%p7837_p4), [#allocation9], 1472  }
  0x84   : > { %6247 = vsyncadd (%p7838_p6), [#allocation9], 4294965824  ;;  %v7815_v0 = vmov 0.0   ;;  %v324_v1 = vld [vmem:[#allocation7 + $0x50] sm:$0xff]  ;;  %v323_v2 = vld [vmem:[#allocation7 + $0x48] sm:$0xff]  ;;  %vm337_vm0 = vcmask 261120  }
  0x85   : > { %413 = vmatprep.mubr.f32.mxu0 %v7815_v0  ;;  %529 = vmatprep.mubr.f32.mxu1 %v7815_v0  ;;  %v322_v3 = vld [vmem:[#allocation7 + $0x38] sm:$0xff]  ;;  %v6512_v4 = vand.u32 4294901760, %v324_v1  ;;  %v6514_v5 = vand.u32 4294901760, %v323_v2  ;;  %v321_v7 = vld [vmem:[#allocation7 + $0x30] sm:$0xff]  ;;  %v320_v8 = vld [vmem:[#allocation7 + $0x20] sm:$0xff]  ;;  %vm6278_vm1 = vmmov 0  }
  0x86   : > { %v6516_v6 = vand.u32 4294901760, %v322_v3  ;;  %v319_v9 = vld [vmem:[#allocation7 + $0x18] sm:$0xff]  ;;  %v6518_v10 = vand.u32 4294901760, %v321_v7  ;;  %v6520_v11 = vand.u32 4294901760, %v320_v8  ;;  %v318_v13 = vld [vmem:[#allocation7 + $0x8] sm:$0xff]  ;;  %v317_v14 = vld [vmem:[#allocation7] sm:$0xff] }
  0x87   : > { %v6522_v12 = vand.u32 4294901760, %v319_v9  ;;  %366 = vmatprep.subr.mxu0 %v6512_v4  ;;  %v6525_v15 = vand.u32 4294901760, %v318_v13  ;;  %v6528_v16 = vsub.f32 %v324_v1, %v6512_v4  ;;  %v6530_v17 = vand.u32 4294901760, %v317_v14  ;;  %v316_v19 = vld [vmem:[%s273_s12] sm:$0x1]  ;;  %v889_v58 = vld [vmem:[#allocation7 + $0x90] sm:$0xff] }
  0x88   : > { %v6533_v18 = vsub.f32 %v323_v2, %v6514_v5  ;;  %368 = vmatpush1.msra.mxu0 %v6514_v5  ;;  %v6537_v20 = vsub.f32 %v322_v3, %v6516_v6  ;;  %v339_v21 = vsel %vm337_vm0, %v316_v19, 0  ;;  %v6541_v22 = vsub.f32 %v321_v7, %v6518_v10  ;;  %v890_v56 = vld [vmem:[#allocation7 + $0xa8] sm:$0xff]  ;;  %v888_v61 = vld [vmem:[#allocation7 + $0x78] sm:$0xff]  ;;  %v887_v2 = vld [vmem:[#allocation7 + $0x60] sm:$0xff]  ;;  %s5755_s24 = sshll.u32 %s6486_s7, 4  ;;  %s6279_s13 = smov 17  }
  0x89   : > { %v6544_v23 = vsub.f32 %v320_v8, %v6520_v11  ;;  %370 = vmatprep.subr.mxu0 %v6516_v6  ;;  %v451_v24 = vand.u32 4294901760, %v6528_v16  ;;  %v6549_v26 = vand.u32 4294901760, %v339_v21  ;;  %v6552_v27 = vsub.f32 %v319_v9, %v6522_v12  ;;  %s6801_s16 = scalar_lea.vmem [#allocation11], %s5755_s24  ;;  %s6280_s30 = smov 96  }
  0x8a   : > { %v457_v25 = vand.u32 4294901760, %v6533_v18  ;;  %372 = vmatpush1.msra.mxu0 %v6518_v10  ;;  %v463_v28 = vand.u32 4294901760, %v6537_v20  ;;  %v469_v29 = vand.u32 4294901760, %v6541_v22  ;;  %v6559_v31 = vsub.f32 %v318_v13, %v6525_v15  ;;  %s6281_s9 = smov 111   ;;  %s6282_s11 = smov 94  }
  0x8b   : > { %v475_v30 = vand.u32 4294901760, %v6544_v23  ;;  %374 = vmatprep.subr.mxu0 %v6520_v11  ;;  %v452_v32 = vsub.f32 %v6528_v16, %v451_v24  ;;  %v415_v34 = vsub.f32 %v339_v21, %v6549_v26  ;;  %v481_v35 = vand.u32 4294901760, %v6552_v27  ;;  %s6283_s8 = smov 126   ;;  %s6284_s27 = smov 95  }
  0x8c   : > { %v458_v33 = vsub.f32 %v6533_v18, %v457_v25  ;;  %376 = vmatpush1.msra.mxu0 %v6522_v12  ;;  %v464_v36 = vsub.f32 %v6537_v20, %v463_v28  ;;  %v470_v37 = vsub.f32 %v6541_v22, %v469_v29  ;;  %v487_v39 = vand.u32 4294901760, %v6559_v31  ;;  %s6285_s14 = smov 110   ;;  %s6286_s15 = smov 112  }
  0x8d   : > { %v476_v38 = vsub.f32 %v6544_v23, %v475_v30  ;;  %378 = vmatprep.subr.mxu0 %v6525_v15  ;;  %v453_v40 = vand.u32 4294901760, %v452_v32  ;;  %v416_v42 = vand.u32 4294901760, %v415_v34  ;;  %v482_v43 = vsub.f32 %v6552_v27, %v481_v35  ;;  %s6287_s17 = smov 127   ;;  %s6289_s26 = smov 92  }
  0x8e   : > { %v459_v41 = vand.u32 4294901760, %v458_v33  ;;  %380 = vmatpush1.msra.mxu0 %v6530_v17  ;;  %v465_v44 = vand.u32 4294901760, %v464_v36  ;;  %v471_v45 = vand.u32 4294901760, %v470_v37  ;;  %v488_v46 = vsub.f32 %v6559_v31, %v487_v39  ;;  %s6290_s23 = smov 20   ;;  %s5762_s12 = sshll.u32 %s6343_s22, 8 }
  0x8f   : > { %454 = vmatprep.subr.mxu1 %v453_v40  ;;  %563 = vmatprep.subr.mxu0 %v6528_v16  ;;  %v417_v47 = vsub.f32 %v415_v34, %v416_v42  ;;  %v477_v48 = vand.u32 4294901760, %v476_v38  ;;  %v492_v49 = vsub.f32 %v317_v14, %v6530_v17  ;;  %v483_v50 = vand.u32 4294901760, %v482_v43  ;;  %s5622_s24 = sshll.u32 %s6801_s16, 4  ;;  %p7868_p0 = scmp.ne.s32.totalorder %s7830_s29, 0  ;;  %s5623_s24 = int_to_ptr.vmem [resolvable:$true] %s5622_s24 }
  0x90   : > { %460 = vmatpush1.msra.mxu1 %v459_v41  ;;  %v489_v52 = vand.u32 4294901760, %v488_v46  ;;  %v6608_v57 = vand.u32 4294901760, %v890_v56  ;;  %v6613_v60 = vand.u32 4294901760, %v889_v58  ;;  %v6621_v1 = vand.u32 4294901760, %v888_v61  ;;  %s6291_s22 = smov [#allocation11]  }
  0x91   : > { %466 = vmatprep.subr.mxu1 %v465_v44  ;;  %v418_v51 = vand.u32 4294901760, %v417_v47  ;;  %v493_v53 = vand.u32 4294901760, %v492_v49  ;;  %vm3137_vm3 = vcmask 138240   ;;  %vm2462_vm5 = vcmask 523264  }
  0x92   : > { %472 = vmatpush1.msra.mxu1 %v471_v45  ;;  %v6611_v59 = vsub.f32 %v890_v56, %v6608_v57  ;;  %v6619_v63 = vsub.f32 %v889_v58, %v6613_v60  ;;  %v1389_v56 = vld [vmem:[#allocation7 + $0xf8] sm:$0xff]  ;;  %vm3232_vm6 = vcmask 769024   ;;  %vm3237_vm7 = vcmask 1043456  }
  0x93   : > { %419 = vmatmul.mubr.f32.vlgmr.msra.gmra.mxu0 %v418_v51  ;;  %478 = vmatprep.subr.mxu1 %v477_v48  ;;  %v494_v54 = vsub.f32 %v492_v49, %v493_v53  ;;  %v6724_v58 = vand.u32 4294901760, %v1389_v56  ;;  %vm3210_vm8 = vcmask 785408   ;;  %vm3221_vm9 = vcmask 777216  }
  0x94   : > { %566 = vmatpush1.msra.mxu0 %v6533_v18  ;;  %484 = vmatpush1.msra.mxu1 %v483_v50  ;;  %v1000_v62 = vand.u32 4294901760, %v6611_v59  ;;  %vm3188_vm10 = vcmask 908288   ;;  %vm3199_vm11 = vcmask 900096   ;;  %vm3166_vm12 = vcmask 1031168  }
  0x95   : > { %569 = vmatprep.subr.mxu0 %v6537_v20  ;;  %490 = vmatprep.subr.mxu1 %v489_v52  ;;  %v495_v55 = vand.u32 4294901760, %v494_v54  ;;  %v325_v20 = vld [vmem:[#allocation8] ss:$4 sm:$0x3]  ;;  %v1392_v52 = vld [vmem:[#allocation7 + $0x110] sm:$0xff]  ;;  %v1391_v54 = vld [vmem:[#allocation7 + $0x108] sm:$0xff] }
  0x96   : > { %572 = vmatpush1.msra.mxu0 %v6541_v22  ;;  %617 = vmatprep.mubr.f32.mxu0 %v7815_v0  ;;  %v1001_v3 = vsub.f32 %v6611_v59, %v1000_v62  ;;  %vm3177_vm13 = vcmask 916480   ;;  %vm3155_vm14 = vcmask 1039360   ;;  %vm3266_vm15 = vcmask 293888  }
  0x97   : > { %575 = vmatprep.subr.mxu0 %v6544_v23  ;;  %496 = vmatpush1.msra.mxu1 %v495_v55  ;;  %v6719_v55 = vand.u32 4294901760, %v1391_v54 }
  0x98   : > { %578 = vmatpush1.msra.mxu0 %v6552_v27  ;;  %531 = vmatmul.mubr.f32.vlgmr.msra.gmra.mxu1 %v6549_v26  ;;  %v1002_v7 = vand.u32 4294901760, %v1001_v3  ;;  %v1385_v3 = vld [vmem:[#allocation7 + $0xd8] sm:$0xff] }
  0x99   : > { %581 = vmatprep.subr.mxu0 %v6559_v31  ;;  %651 = vmatprep.subr.mxu1 %v6512_v4 }
  0x9a   : > { %584 = vmatpush1.msra.mxu0 %v492_v49  ;;  %653 = vmatpush1.msra.mxu1 %v6514_v5 }
  0x9b   : > { %620 = vmatmul.mubr.f32.vlgmr.msra.gmra.mxu0 %v415_v34  ;;  %655 = vmatprep.subr.mxu1 %v6516_v6 }
  0x9c   : > { %735 = vmatprep.subr.mxu0 %v451_v24  ;;  %657 = vmatpush1.msra.mxu1 %v6518_v10 }
  0x9d   : > { %739 = vmatpush1.msra.mxu0 %v457_v25  ;;  %659 = vmatprep.subr.mxu1 %v6520_v11 }
  0x9e   : > { %743 = vmatprep.subr.mxu0 %v463_v28  ;;  %661 = vmatpush1.msra.mxu1 %v6522_v12 }
  0x9f   : > { %747 = vmatpush1.msra.mxu0 %v469_v29  ;;  %663 = vmatprep.subr.mxu1 %v6525_v15 }
  0xa0   : > { %751 = vmatprep.subr.mxu0 %v475_v30  ;;  %665 = vmatpush1.msra.mxu1 %v6530_v17 }
  0xa1   : > { %698 = vmatprep.mubr.f32.mxu1 %v7815_v0  ;;  %755 = vmatpush1.msra.mxu0 %v481_v35 }
  0xa2   : > { %702 = vmatmul.mubr.f32.vlgmr.msra.gmra.mxu1 %v416_v42  ;;  %759 = vmatprep.subr.mxu0 %v487_v39 }
  0xa3   : > { %829 = vmatprep.subr.mxu1 %v6512_v4  ;;  %763 = vmatpush1.msra.mxu0 %v493_v53  ;;  %v1007_v4 = vand.u32 4294901760, %v6619_v63  ;;  %v6717_v53 = vand.u32 4294901760, %v1392_v52 }
  0xa4   : > { %796 = vmatprep.mubr.f32.mxu0 %v7815_v0  ;;  %831 = vmatpush1.msra.mxu1 %v6514_v5  ;;  %v6630_v5 = vsub.f32 %v888_v61, %v6621_v1 }
  0xa5   : > { %798 = vmatmul.mubr.f32.vlgmr.msra.gmra.mxu0 %v6549_v26  ;;  %833 = vmatprep.subr.mxu1 %v6516_v6  ;;  %v6632_v6 = vand.u32 4294901760, %v887_v2  ;;  %v1008_v8 = vsub.f32 %v6619_v63, %v1007_v4 }
  0xa6   : > { %835 = vmatpush1.msra.mxu1 %v6518_v10  ;;  %876 = vmatprep.mubr.f32.mxu1 %v7815_v0  ;;  %v1014_v9 = vand.u32 4294901760, %v6630_v5 }
  0xa7   : > { %837 = vmatprep.subr.mxu1 %v6520_v11  ;;  %5823 = vmatprep.subr.mxu0 %v7815_v0  ;;  %v6641_v10 = vsub.f32 %v887_v2, %v6632_v6  ;;  %v1009_v11 = vand.u32 4294901760, %v1008_v8 }
  0xa8   : > { %839 = vmatpush1.msra.mxu1 %v6522_v12  ;;  %5824 = vmatpush3.msra.mxu0 %v6608_v57  ;;  %v1015_v12 = vsub.f32 %v6630_v5, %v1014_v9 }
  0xa9   : > { %841 = vmatprep.subr.mxu1 %v6525_v15  ;;  %5825 = vmatprep.subr.mxu0 %v7815_v0  ;;  %v1021_v13 = vand.u32 4294901760, %v6641_v10 }
  0xaa   : > { %843 = vmatpush1.msra.mxu1 %v6530_v17  ;;  %5826 = vmatpush3.msra.mxu0 %v6613_v60  ;;  %v1016_v14 = vand.u32 4294901760, %v1015_v12  ;;  %v327_v17 = vlaneseq  ;;  %v1382_v12 = vld [vmem:[#allocation7 + $0xc0] sm:$0xff] }
  0xab   : > { %878 = vmatmul.mubr.f32.vlgmr.msra.gmra.mxu1 %v6549_v26  ;;  %5834 = vmatprep.subr.mxu1 %v7815_v0  ;;  %v1022_v15 = vsub.f32 %v6641_v10, %v1021_v13 }
  0xac   : > { %5827 = vmatprep.subr.mxu0 %v7815_v0  ;;  %5835 = vmatpush3.msra.mxu1 %v1002_v7  ;;  %v6660_v18 = vshrl.u32 %v327_v17, 7  ;;  %v1383_v7 = vld [vmem:[#allocation7 + $0xc8] sm:$0xff] }
  0xad   : > { %5828 = vmatpush3.msra.mxu0 %v6621_v1  ;;  %5836 = vmatprep.subr.mxu1 %v7815_v0  ;;  %v1023_v16 = vand.u32 4294901760, %v1022_v15 }
  0xae   : > { %5829 = vmatprep.subr.mxu0 %v7815_v0  ;;  %5837 = vmatpush3.msra.mxu1 %v1009_v11  ;;  %v6663_v19 = vsub.s32 1, %v6660_v18  ;;  %v6667_v23 = vsub.s32 0, %v6660_v18  ;;  %v6754_v11 = vand.u32 4294901760, %v1383_v7 }
  0xaf   : > { %5830 = vmatpush3.msra.mxu0 %v6632_v6  ;;  %5838 = vmatprep.subr.mxu1 %v7815_v0 }
  0xb0   : > { %5845 = vmatprep.subr.mxu0 %v7815_v0  ;;  %5839 = vmatpush3.msra.mxu1 %v1016_v14  ;;  %7839 = vst [vmem:[#allocation17_spill] sm:$0xff] %v6663_v19  ;;  %v334_v22 = vrot.slane %v325_v20, %v6663_v19  ;;  %7840 = vst [vmem:[#allocation18_spill] sm:$0xff] %v6667_v23  ;;  %v330_v26 = vrot.slane %v325_v20, %v6667_v23 }
  0xb1   : > { %5840 = vmatprep.subr.mxu1 %v7815_v0  ;;  %5842 = vmatprep.mubr.msk.f32.mxu1 %vm6278_vm1, %v7815_v0 }
  0xb2   : > { %5841 = vmatpush3.msra.mxu1 %v1023_v16  ;;  %5831 = vmatprep.mubr.msk.f32.mxu0 %vm6278_vm1, %v7815_v0  ;;  %v6764_v16 = vand.u32 4294901760, %v1382_v12 }
  0xb3   : > { %5856 = vmatprep.subr.mxu1 %v7815_v0 }
 0x153   : > { %v420_v21 = vpop.f32.mrf.mxu0 }
 0x154   : > { %v421_v31 = vadd.f32 %v420_v21, %v330_v26 }
 0x155   : > { %v422_v24 = vpop.f32.mrf.mxu0 }
 0x156   : > { %v423_v25 = vadd.f32 %v422_v24, %v334_v22  ;;  %v6772_v22 = vsub.f32 %v1383_v7, %v6754_v11 }
 0x158   : > { %v532_v27 = vpop.f32.mrf.mxu1 }
 0x159   : > { %v533_v34 = vadd.f32 %v532_v27, %v421_v31  ;;  %v6780_v27 = vsub.f32 %v1382_v12, %v6764_v16 }
 0x15a   : > { %v534_v28 = vpop.f32.mrf.mxu1 }
 0x15b   : > { %v535_v29 = vadd.f32 %v534_v28, %v423_v25  ;;  %v621_v30 = vpop.f32.mrf.mxu0 }
 0x15c   : > { %v622_v36 = vadd.f32 %v621_v30, %v533_v34  ;;  %v1561_v30 = vand.u32 4294901760, %v6772_v22 }
 0x15d   : > { %v623_v32 = vpop.f32.mrf.mxu0 }
 0x15e   : > { %v624_v33 = vadd.f32 %v623_v32, %v535_v29 }
 0x162   : > { %v703_v35 = vpop.f32.mrf.mxu1 }
 0x163   : > { %v704_v39 = vadd.f32 %v703_v35, %v622_v36  ;;  %v1562_v35 = vsub.f32 %v6772_v22, %v1561_v30 }
 0x164   : > { %v705_v37 = vpop.f32.mrf.mxu1 }
 0x165   : > { %v6670_v38 = vadd.f32 %v705_v37, %v624_v33  ;;  %v799_v40 = vpop.f32.mrf.mxu0  ;;  %v1567_v33 = vand.u32 4294901760, %v6780_v27 }
 0x166   : > { %v800_v41 = vadd.f32 %v799_v40, %v704_v39  ;;  %v1563_v39 = vand.u32 4294901760, %v1562_v35 }
 0x167   : > { %v1568_v37 = vsub.f32 %v6780_v27, %v1567_v33 }
 0x169   : > { %v1569_v40 = vand.u32 4294901760, %v1568_v37 }
 0x16b   : > { %v879_v42 = vpop.f32.mrf.mxu1 }
 0x16c   : > { %v880_v43 = vadd.f32 %v879_v42, %v800_v41  ;;  %v3130_v41 = vld [vmem:[%s6490_s28] sm:$0xff]  ;;  %s6288_s28 = smov 56  }
 0x16d   : > { %3133 = vrot.lane.b32.xlu0 %v3130_v41, %s6279_s13  ;;  %v3132_v42 = vcombine.high %v3130_v41, %v3130_v41  ;;  %5570 = vst [vmem:[%s6801_s16] sm:$0xf] %v3130_v41 }
 0x16e   : > { %vm884_vm2 = vcmp.gt.f32.partialorder %v880_v43, 0.0  ;;  %v885_v44 = vmul.f32 0.2, %v880_v43 }
 0x16f   : > { %5571 = vst [vmem:[%s6801_s16 + $0x8] sm:$0xf] %v3132_v42 }
 0x170   : > { %v886_v45 = vsel %vm884_vm2, %v880_v43, %v885_v44  ;;  %v881_v43 = vpop.f32.mrf.mxu1  ;;  %vm5593_vm2 = vcmask 1041408  }
 0x171   : > { %v892_v46 = vsel %vm337_vm0, %v886_v45, 0  ;;  %3135 = vrot.lane.b32.xlu0 %v3132_v42, %s6279_s13 }
 0x172   : > { %v963_v47 = vand.u32 4294901760, %v892_v46 }
 0x174   : > { %v964_v48 = vsub.f32 %v892_v46, %v963_v47  ;;  %5843 = vmatmul.mubr.f32.vlgmr.msra.gmra.mxu1 %v963_v47  ;;  %v801_v46 = vpop.f32.mrf.mxu0 }
 0x175   : > { %5857 = vmatpush3.msra.mxu1 %v6608_v57  ;;  %5864 = vmatprep.mubr.msk.f32.mxu1 %vm6278_vm1, %v7815_v0 }
 0x176   : > { %5858 = vmatprep.subr.mxu1 %v7815_v0  ;;  %v965_v49 = vand.u32 4294901760, %v964_v48 }
 0x177   : > { %5859 = vmatpush3.msra.mxu1 %v6613_v60 }
 0x178   : > { %5860 = vmatprep.subr.mxu1 %v7815_v0  ;;  %v966_v50 = vsub.f32 %v964_v48, %v965_v49 }
 0x179   : > { %5861 = vmatpush3.msra.mxu1 %v6621_v1 }
 0x17a   : > { %5862 = vmatprep.subr.mxu1 %v7815_v0  ;;  %v967_v51 = vand.u32 4294901760, %v966_v50 }
 0x17b   : > { %5863 = vmatpush3.msra.mxu1 %v6632_v6 }
 0x17c   : > { %5865 = vmatmul.mubr.f32.vlgmr.msra.gmra.mxu1 %v965_v49  ;;  %5878 = vmatprep.subr.mxu1 %v7815_v0 }
 0x17d   : > { %5832 = vmatmul.mubr.f32.vlgmr.msra.gmra.mxu0 %v967_v51  ;;  %5879 = vmatpush3.msra.mxu1 %v6608_v57  ;;  %v6722_v57 = vsub.f32 %v1392_v52, %v6717_v53 }
 0x17e   : > { %5846 = vmatpush3.msra.mxu0 %v6611_v59  ;;  %5880 = vmatprep.subr.mxu1 %v7815_v0  ;;  %v1388_v59 = vld [vmem:[#allocation7 + $0xf0] sm:$0xff] }
 0x17f   : > { %5847 = vmatprep.subr.mxu0 %v7815_v0  ;;  %5881 = vmatpush3.msra.mxu1 %v6613_v60  ;;  %v6728_v60 = vsub.f32 %v1391_v54, %v6719_v55  ;;  %v6730_v61 = vand.u32 4294901760, %v1388_v59 }
 0x180   : > { %5848 = vmatpush3.msra.mxu0 %v6619_v63  ;;  %5882 = vmatprep.subr.mxu1 %v7815_v0  ;;  %v1525_v63 = vand.u32 4294901760, %v6722_v57 }
 0x181   : > { %5849 = vmatprep.subr.mxu0 %v7815_v0  ;;  %5883 = vmatpush3.msra.mxu1 %v6621_v1  ;;  %v6735_v1 = vsub.f32 %v1389_v56, %v6724_v58 }
 0x182   : > { %5850 = vmatpush3.msra.mxu0 %v6630_v5  ;;  %5884 = vmatprep.subr.mxu1 %v7815_v0  ;;  %v6742_v5 = vsub.f32 %v1388_v59, %v6730_v61  ;;  %v1526_v8 = vsub.f32 %v6722_v57, %v1525_v63 }
 0x183   : > { %5851 = vmatprep.subr.mxu0 %v7815_v0  ;;  %5853 = vmatprep.mubr.msk.f32.mxu0 %vm6278_vm1, %v7815_v0 }
 0x184   : > { %5852 = vmatpush3.msra.mxu0 %v6641_v10  ;;  %5885 = vmatpush3.msra.mxu1 %v6632_v6  ;;  %v6744_v6 = vand.u32 4294901760, %v1385_v3  ;;  %v1543_v14 = vand.u32 4294901760, %v6742_v5  ;;  %v1527_v17 = vand.u32 4294901760, %v1526_v8  ;;  %v802_v8 = vadd.f32 %v801_v46, %v6670_v38  ;;  %v1387_v38 = vld [vmem:[#allocation7 + $0xe8] sm:$0xff] }
 0x185   : > { %5886 = vmatprep.mubr.msk.f32.mxu1 %vm6278_vm1, %v7815_v0  ;;  %5854 = vmatmul.mubr.f32.vlgmr.msra.gmra.mxu0 %v964_v48 }
 0x186   : > { %5867 = vmatprep.subr.mxu0 %v7815_v0  ;;  %5887 = vmatmul.mubr.f32.vlgmr.msra.gmra.mxu1 %v963_v47  ;;  %v6762_v15 = vsub.f32 %v1385_v3, %v6744_v6  ;;  %v1544_v25 = vsub.f32 %v6742_v5, %v1543_v14 }
 0x187   : > { %5868 = vmatpush3.msra.mxu0 %v1000_v62  ;;  %5875 = vmatprep.mubr.msk.f32.mxu0 %vm6278_vm1, %v7815_v0  ;;  %v1386_v62 = vld [vmem:[#allocation7 + $0xe0] sm:$0xff] }
 0x188   : > { %5869 = vmatprep.subr.mxu0 %v7815_v0  ;;  %1603 = vmatprep.mubr.f32.mxu1 %v7815_v0  ;;  %v6737_v2 = vand.u32 4294901760, %v1386_v62  ;;  %v1555_v26 = vand.u32 4294901760, %v6762_v15  ;;  %v1545_v31 = vand.u32 4294901760, %v1544_v25 }
 0x189   : > { %5870 = vmatpush3.msra.mxu0 %v1007_v4  ;;  %v1531_v4 = vand.u32 4294901760, %v6728_v60  ;;  %1528 = vmatprep.subr.mxu1 %v1527_v17  ;;  %v882_v17 = vadd.f32 %v881_v43, %v802_v8  ;;  %v6830_v43 = vand.u32 4294901760, %v1387_v38 }
 0x18a   : > { %5871 = vmatprep.subr.mxu0 %v7815_v0  ;;  %v6752_v10 = vsub.f32 %v1386_v62, %v6737_v2  ;;  %v1556_v32 = vsub.f32 %v6762_v15, %v1555_v26 }
 0x18b   : > { %5872 = vmatpush3.msra.mxu0 %v1014_v9  ;;  %v1537_v9 = vand.u32 4294901760, %v6735_v1 }
 0x18c   : > { %5873 = vmatprep.subr.mxu0 %v7815_v0  ;;  %v1549_v21 = vand.u32 4294901760, %v6752_v10  ;;  %v1557_v36 = vand.u32 4294901760, %v1556_v32 }
 0x18d   : > { %5874 = vmatpush3.msra.mxu0 %v1021_v13  ;;  %v1532_v13 = vsub.f32 %v6728_v60, %v1531_v4  ;;  %v1538_v20 = vsub.f32 %v6735_v1, %v1537_v9 }
 0x18e   : > { %5876 = vmatmul.mubr.f32.vlgmr.msra.gmra.mxu0 %v963_v47  ;;  %1440 = vmatprep.subr.mxu0 %v6717_v53  ;;  %v1550_v29 = vsub.f32 %v6752_v10, %v1549_v21 }
 0x18f   : > { %1487 = vmatprep.mubr.f32.mxu0 %v7815_v0  ;;  %1442 = vmatpush1.msra.mxu0 %v6719_v55  ;;  %v1533_v24 = vand.u32 4294901760, %v1532_v13  ;;  %v1539_v28 = vand.u32 4294901760, %v1538_v20 }
 0x190   : > { %1444 = vmatprep.subr.mxu0 %v6724_v58  ;;  %v1551_v34 = vand.u32 4294901760, %v1550_v29 }
 0x191   : > { %1446 = vmatpush1.msra.mxu0 %v6730_v61  ;;  %1534 = vmatpush1.msra.mxu1 %v1533_v24  ;;  %v1380_v24 = vld [vmem:[#allocation8 + $0x1] sm:$0x1] }
 0x192   : > { %1448 = vmatprep.subr.mxu0 %v6737_v2  ;;  %1540 = vmatprep.subr.mxu1 %v1539_v28 }
 0x193   : > { %1450 = vmatpush1.msra.mxu0 %v6744_v6  ;;  %1546 = vmatpush1.msra.mxu1 %v1545_v31  ;;  %v1393_v31 = vld [vmem:[#allocation7 + $0x118] sm:$0xff] }
 0x194   : > { %1452 = vmatprep.subr.mxu0 %v6754_v11  ;;  %1552 = vmatprep.subr.mxu1 %v1551_v34  ;;  %v1390_v34 = vld [vmem:[#allocation7 + $0x100] sm:$0xff] }
 0x195   : > { %1454 = vmatpush1.msra.mxu0 %v6764_v16  ;;  %1558 = vmatpush1.msra.mxu1 %v1557_v36  ;;  %v6813_v36 = vand.u32 4294901760, %v1393_v31 }
 0x196   : > { %1637 = vmatprep.subr.mxu0 %v6722_v57  ;;  %1564 = vmatprep.subr.mxu1 %v1563_v39  ;;  %v6821_v39 = vand.u32 4294901760, %v1390_v34 }
 0x197   : > { %1570 = vmatpush1.msra.mxu1 %v1569_v40  ;;  %v1384_v40 = vld [vmem:[#allocation7 + $0xd0] sm:$0xff]  ;;  %v6828_v42 = vsub.f32 %v1393_v31, %v6813_v36 }
 0x198   : > { %1725 = vmatprep.subr.mxu1 %v6717_v53  ;;  %v6839_v46 = vand.u32 4294901760, %v1384_v40 }
 0x234   : > { %v1060_v44 = vpop.f32.mrf.mxu1 }
 0x236   : > { %v5844_v45 = vpop.f32.mrf.mxu1 }
 0x237   : > { %v6837_v45 = vsub.f32 %v1390_v34, %v6821_v39 }
 0x23c   : > { %v1217_v47 = vpop.f32.mrf.mxu1 }
 0x23d   : > { %v969_v48 = vpop.f32.mrf.mxu0 }
 0x23e   : > { %v5866_v49 = vpop.f32.mrf.mxu1  ;;  %v1061_v54 = vadd.f32 %v1060_v44, %v969_v48  ;;  %v6846_v48 = vsub.f32 %v1387_v38, %v6830_v43 }
 0x23f   : > { %v5833_v50 = vpop.f32.mrf.mxu0  ;;  %v2071_v49 = vand.u32 4294901760, %v6837_v45 }
 0x240   : > { %v6854_v50 = vsub.f32 %v1384_v40, %v6839_v46 }
 0x245   : > { %v1140_v51 = vpop.f32.mrf.mxu0 }
 0x246   : > { %v1375_v52 = vpop.f32.mrf.mxu1  ;;  %v1141_v62 = vadd.f32 %v1140_v51, %v1061_v54 }
 0x247   : > { %v5855_v56 = vpop.f32.mrf.mxu0 }
 0x248   : > { %v5888_v59 = vpop.f32.mrf.mxu1  ;;  %v1218_v3 = vadd.f32 %v1217_v47, %v1141_v62  ;;  %v2064_v47 = vand.u32 4294901760, %v6828_v42 }
 0x24e   : > { %v1300_v7 = vpop.f32.mrf.mxu0 }
 0x24f   : > { %v1301_v12 = vadd.f32 %v1300_v7, %v1218_v3  ;;  %v2455_v3 = vld [vmem:[#allocation7 + $0x188] sm:$0xff] }
 0x250   : > { %v5877_v13 = vpop.f32.mrf.mxu0 }
 0x251   : > { %v1376_v20 = vadd.f32 %v1375_v52, %v1301_v12  ;;  %v6993_v52 = vpop.permute.xlu0 %3133  ;;  %v7014_v13 = vand.u32 4294901760, %v2455_v3 }
 0x252   : > { %v7004_v62 = vsel %vm3137_vm3, 0.0, %v6993_v52 }
 0x253   : > { %v1379_v25 = vadd.f32 %v1376_v20, %v882_v17  ;;  %v2454_v17 = vld [vmem:[#allocation7 + $0x180] sm:$0xff]  ;;  %3204 = vrot.lane.b32.xlu1 %v7004_v62, %s6280_s30  ;;  %3226 = vrot.lane.b32.xlu0 %v7004_v62, %s6282_s11 }
 0x255   : > { %v1381_v28 = vadd.f32 %v1380_v24, %v1379_v25 }
 0x257   : > { %v1413_v29 = vsel %vm337_vm0, %v1381_v28, 0  ;;  %v7024_v28 = vand.u32 4294901760, %v2454_v17  ;;  %3182 = vrot.lane.b32.xlu1 %v7004_v62, %s6281_s9  ;;  %vm4996_vm0 = vcmask 162816  }
 0x258   : > { %v6807_v32 = vand.u32 4294901760, %v1413_v29 }
 0x259   : > { %v7040_v40 = vsub.f32 %v2454_v17, %v7024_v28 }
 0x25a   : > { %v6810_v35 = vsub.f32 %v1413_v29, %v6807_v32  ;;  %1605 = vmatmul.mubr.f32.vlgmr.msra.gmra.mxu1 %v6807_v32  ;;  %v2453_v29 = vld [vmem:[#allocation7 + $0x170] sm:$0xff] }
 0x25b   : > { %1727 = vmatpush1.msra.mxu1 %v6719_v55  ;;  %1772 = vmatprep.mubr.f32.mxu1 %v7815_v0 }
 0x25c   : > { %1729 = vmatprep.subr.mxu1 %v6724_v58  ;;  %v6819_v37 = vand.u32 4294901760, %v6810_v35  ;;  %3160 = vrot.lane.b32.xlu1 %v7004_v62, %s6283_s8 }
 0x25d   : > { %1731 = vmatpush1.msra.mxu1 %v6730_v61 }
 0x25e   : > { %1733 = vmatprep.subr.mxu1 %v6737_v2  ;;  %v1491_v41 = vsub.f32 %v6810_v35, %v6819_v37 }
 0x25f   : > { %1735 = vmatpush1.msra.mxu1 %v6744_v6 }
 0x260   : > { %1737 = vmatprep.subr.mxu1 %v6754_v11  ;;  %v6834_v44 = vand.u32 4294901760, %v1491_v41  ;;  %v2451_v41 = vld [vmem:[#allocation7 + $0x158] sm:$0xff] }
 0x261   : > { %1739 = vmatpush1.msra.mxu1 %v6764_v16 }
 0x262   : > { %1776 = vmatmul.mubr.f32.vlgmr.msra.gmra.mxu1 %v6819_v37  ;;  %1903 = vmatprep.subr.mxu1 %v6717_v53  ;;  %v2065_v53 = vsub.f32 %v6828_v42, %v2064_v47 }
 0x263   : > { %1493 = vmatmul.mubr.f32.vlgmr.msra.gmra.mxu0 %v6834_v44  ;;  %1905 = vmatpush1.msra.mxu1 %v6719_v55  ;;  %v2078_v55 = vand.u32 4294901760, %v6846_v48 }
 0x264   : > { %1640 = vmatpush1.msra.mxu0 %v6728_v60  ;;  %1907 = vmatprep.subr.mxu1 %v6724_v58  ;;  %v2072_v58 = vsub.f32 %v6837_v45, %v2071_v49  ;;  %v2461_v60 = vld [vmem:[#allocation7 + $0x1d0] sm:$0xff] }
 0x265   : > { %1643 = vmatprep.subr.mxu0 %v6735_v1  ;;  %1909 = vmatpush1.msra.mxu1 %v6730_v61  ;;  %v2085_v61 = vand.u32 4294901760, %v6854_v50  ;;  %v2460_v1 = vld [vmem:[#allocation7 + $0x1c8] sm:$0xff] }
 0x266   : > { %1646 = vmatpush1.msra.mxu0 %v6742_v5  ;;  %1911 = vmatprep.subr.mxu1 %v6737_v2  ;;  %v2066_v2 = vand.u32 4294901760, %v2065_v53  ;;  %v2459_v5 = vld [vmem:[#allocation7 + $0x1b8] sm:$0xff]  ;;  %v2449_v53 = vld [vmem:[#allocation7 + $0x140] sm:$0xff] }
 0x267   : > { %1649 = vmatprep.subr.mxu0 %v6752_v10  ;;  %1913 = vmatpush1.msra.mxu1 %v6744_v6  ;;  %v2079_v6 = vsub.f32 %v6846_v48, %v2078_v55  ;;  %v2086_v51 = vsub.f32 %v6854_v50, %v2085_v61  ;;  %v6978_v10 = vand.u32 4294901760, %v2459_v5 }
 0x268   : > { %1652 = vmatpush1.msra.mxu0 %v6762_v15  ;;  %1915 = vmatprep.subr.mxu1 %v6754_v11  ;;  %v2073_v11 = vand.u32 4294901760, %v2072_v58 }
 0x269   : > { %1655 = vmatprep.subr.mxu0 %v6772_v22  ;;  %1691 = vmatprep.mubr.f32.mxu0 %v7815_v0  ;;  %v2087_v57 = vand.u32 4294901760, %v2086_v51  ;;  %v2457_v22 = vld [vmem:[#allocation7 + $0x1a0] sm:$0xff] }
 0x26a   : > { %1658 = vmatpush1.msra.mxu0 %v6780_v27  ;;  %1917 = vmatpush1.msra.mxu1 %v6764_v16  ;;  %v2080_v16 = vand.u32 4294901760, %v2079_v6  ;;  %v6989_v27 = vsub.f32 %v2459_v5, %v6978_v10  ;;  %v2448_v6 = vld [vmem:[#allocation7 + $0x138] sm:$0xff] }
 0x26b   : > { %1950 = vmatprep.mubr.f32.mxu1 %v7815_v0  ;;  %1694 = vmatmul.mubr.f32.vlgmr.msra.gmra.mxu0 %v6810_v35 }
 0x26c   : > { %1809 = vmatprep.subr.mxu0 %v1525_v63  ;;  %1952 = vmatmul.mubr.f32.vlgmr.msra.gmra.mxu1 %v6807_v32  ;;  %v6971_v63 = vand.u32 4294901760, %v2461_v60  ;;  %v7812_v8 = vand.u32 4294901760, %v6989_v27 }
 0x26d   : > { %5900 = vmatprep.subr.mxu1 %v7815_v0  ;;  %1813 = vmatpush1.msra.mxu0 %v1531_v4  ;;  %v6973_v4 = vand.u32 4294901760, %v2460_v1 }
 0x26e   : > { %5901 = vmatpush3.msra.mxu1 %v2066_v2  ;;  %1817 = vmatprep.subr.mxu0 %v1537_v9  ;;  %v6976_v9 = vsub.f32 %v2461_v60, %v6971_v63  ;;  %v7061_v2 = vand.u32 4294901760, %v2451_v41  ;;  %v2447_v60 = vld [vmem:[#allocation7 + $0x128] sm:$0xff] }
 0x26f   : > { %5902 = vmatprep.subr.mxu1 %v7815_v0  ;;  %1821 = vmatpush1.msra.mxu0 %v1543_v14  ;;  %v2458_v14 = vld [vmem:[#allocation7 + $0x1b0] sm:$0xff]  ;;  %v6982_v15 = vsub.f32 %v2460_v1, %v6973_v4 }
 0x270   : > { %5903 = vmatpush3.msra.mxu1 %v2073_v11  ;;  %1825 = vmatprep.subr.mxu0 %v1549_v21  ;;  %v6984_v21 = vand.u32 4294901760, %v2458_v14 }
 0x271   : > { %5904 = vmatprep.subr.mxu1 %v7815_v0  ;;  %1829 = vmatpush1.msra.mxu0 %v1555_v26  ;;  %v7814_v26 = vand.u32 4294901760, %v6976_v9  ;;  %v7813_v54 = vand.u32 4294901760, %v6982_v15 }
 0x272   : > { %5905 = vmatpush3.msra.mxu1 %v2080_v16  ;;  %1833 = vmatprep.subr.mxu0 %v1561_v30  ;;  %v6991_v30 = vand.u32 4294901760, %v2457_v22  ;;  %v6998_v56 = vsub.f32 %v2458_v14, %v6984_v21  ;;  %v7075_v14 = vsub.f32 %v2451_v41, %v7061_v2 }
 0x273   : > { %5906 = vmatprep.subr.mxu1 %v7815_v0  ;;  %1837 = vmatpush1.msra.mxu0 %v1567_v33  ;;  %v2456_v33 = vld [vmem:[#allocation7 + $0x198] sm:$0xff]  ;;  %v2577_v7 = vsub.f32 %v6976_v9, %v7814_v26  ;;  %v2583_v20 = vsub.f32 %v6982_v15, %v7813_v54 }
 0x274   : > { %1870 = vmatprep.mubr.f32.mxu0 %v7815_v0  ;;  %5907 = vmatpush3.msra.mxu1 %v2087_v57  ;;  %v7000_v59 = vand.u32 4294901760, %v2456_v33  ;;  %v7012_v12 = vsub.f32 %v2457_v22, %v6991_v30  ;;  %v7811_v24 = vand.u32 4294901760, %v6998_v56  ;;  %v7077_v22 = vand.u32 4294901760, %v2449_v53 }
 0x275   : > { %5908 = vmatprep.mubr.msk.f32.mxu1 %vm6278_vm1, %v7815_v0  ;;  %1872 = vmatmul.mubr.f32.vlgmr.msra.gmra.mxu0 %v6807_v32  ;;  %v2578_v31 = vand.u32 4294901760, %v2577_v7  ;;  %v2584_v38 = vand.u32 4294901760, %v2583_v20  ;;  %v7084_v20 = vand.u32 4294901760, %v2448_v6 }
 0x276   : > { %5889 = vmatprep.subr.mxu0 %v7815_v0  ;;  %5909 = vmatmul.mubr.f32.vlgmr.msra.gmra.mxu1 %v6807_v32  ;;  %v7022_v25 = vsub.f32 %v2456_v33, %v7000_v59  ;;  %v7810_v34 = vand.u32 4294901760, %v7012_v12  ;;  %v2446_v33 = vld [vmem:[#allocation7 + $0x120] sm:$0xff] }
 0x277   : > { %5922 = vmatprep.subr.mxu1 %v7815_v0  ;;  %5890 = vmatpush3.msra.mxu0 %v6813_v36  ;;  %v7102_v41 = vsub.f32 %v2448_v6, %v7084_v20 }
 0x278   : > { %5923 = vmatpush3.msra.mxu1 %v6813_v36  ;;  %5891 = vmatprep.subr.mxu0 %v7815_v0 }
 0x279   : > { %5924 = vmatprep.subr.mxu1 %v7815_v0  ;;  %5892 = vmatpush3.msra.mxu0 %v6821_v39 }
 0x27a   : > { %5925 = vmatpush3.msra.mxu1 %v6821_v39  ;;  %5893 = vmatprep.subr.mxu0 %v7815_v0 }
 0x27b   : > { %5926 = vmatprep.subr.mxu1 %v7815_v0  ;;  %5894 = vmatpush3.msra.mxu0 %v6830_v43 }
 0x27c   : > { %5927 = vmatpush3.msra.mxu1 %v6830_v43  ;;  %5895 = vmatprep.subr.mxu0 %v7815_v0 }
 0x27d   : > { %5928 = vmatprep.subr.mxu1 %v7815_v0  ;;  %5896 = vmatpush3.msra.mxu0 %v6839_v46 }
 0x27e   : > { %5897 = vmatprep.mubr.msk.f32.mxu0 %vm6278_vm1, %v7815_v0  ;;  %5929 = vmatpush3.msra.mxu1 %v6839_v46 }
 0x27f   : > { %5930 = vmatprep.mubr.msk.f32.mxu1 %vm6278_vm1, %v7815_v0  ;;  %5898 = vmatmul.mubr.f32.vlgmr.msra.gmra.mxu0 %v6834_v44 }
 0x280   : > { %5911 = vmatprep.subr.mxu0 %v7815_v0  ;;  %5931 = vmatmul.mubr.f32.vlgmr.msra.gmra.mxu1 %v6819_v37  ;;  %v2595_v37 = vsub.f32 %v6998_v56, %v7811_v24 }
 0x281   : > { %5944 = vmatprep.subr.mxu1 %v7815_v0  ;;  %5912 = vmatpush3.msra.mxu0 %v6828_v42 }
 0x282   : > { %5945 = vmatpush3.msra.mxu1 %v6813_v36  ;;  %5913 = vmatprep.subr.mxu0 %v7815_v0  ;;  %v2452_v36 = vld [vmem:[#allocation7 + $0x168] sm:$0xff] }
 0x283   : > { %5946 = vmatprep.subr.mxu1 %v7815_v0  ;;  %5914 = vmatpush3.msra.mxu0 %v6837_v45  ;;  %v7047_v45 = vand.u32 4294901760, %v2453_v29 }
 0x284   : > { %5947 = vmatpush3.msra.mxu1 %v6821_v39  ;;  %5915 = vmatprep.subr.mxu0 %v7815_v0  ;;  %v7809_v39 = vand.u32 4294901760, %v7022_v25 }
 0x285   : > { %5948 = vmatprep.subr.mxu1 %v7815_v0  ;;  %5916 = vmatpush3.msra.mxu0 %v6846_v48 }
 0x286   : > { %5949 = vmatpush3.msra.mxu1 %v6830_v43  ;;  %5917 = vmatprep.subr.mxu0 %v7815_v0  ;;  %v2601_v43 = vsub.f32 %v7012_v12, %v7810_v34  ;;  %v2607_v48 = vsub.f32 %v7022_v25, %v7809_v39 }
 0x287   : > { %5950 = vmatprep.subr.mxu1 %v7815_v0  ;;  %5918 = vmatpush3.msra.mxu0 %v6854_v50  ;;  %v7053_v50 = vand.u32 4294901760, %v2452_v36 }
 0x288   : > { %5919 = vmatprep.mubr.msk.f32.mxu0 %vm6278_vm1, %v7815_v0  ;;  %5951 = vmatpush3.msra.mxu1 %v6839_v46  ;;  %v2450_v46 = vld [vmem:[#allocation7 + $0x150] sm:$0xff]  ;;  %v2608_v11 = vand.u32 4294901760, %v2607_v48 }
 0x289   : > { %5952 = vmatprep.mubr.msk.f32.mxu1 %vm6278_vm1, %v7815_v0  ;;  %5920 = vmatmul.mubr.f32.vlgmr.msra.gmra.mxu0 %v6810_v35  ;;  %v7032_v35 = vsub.f32 %v2455_v3, %v7014_v13  ;;  %v7068_v16 = vsub.f32 %v2452_v36, %v7053_v50  ;;  %v7070_v57 = vand.u32 4294901760, %v2450_v46  ;;  %v7094_v36 = vand.u32 4294901760, %v2447_v60 }
 0x28a   : > { %5933 = vmatprep.subr.mxu0 %v7815_v0  ;;  %5953 = vmatmul.mubr.f32.vlgmr.msra.gmra.mxu1 %v6807_v32 }
 0x28b   : > { %5934 = vmatpush3.msra.mxu0 %v2064_v47  ;;  %5941 = vmatprep.mubr.msk.f32.mxu0 %vm6278_vm1, %v7815_v0  ;;  %v7808_v44 = vand.u32 4294901760, %v7032_v35  ;;  %v2596_v47 = vand.u32 4294901760, %v2595_v37  ;;  %v7805_v7 = vand.u32 4294901760, %v7068_v16  ;;  %v7082_v17 = vsub.f32 %v2450_v46, %v7070_v57 }
 0x28c   : > { %5935 = vmatprep.subr.mxu0 %v7815_v0  ;;  %2702 = vmatprep.mubr.f32.mxu1 %v7815_v0  ;;  %vm5590_vm1 = vcmask 1040384  }
 0x28d   : > { %5936 = vmatpush3.msra.mxu0 %v2071_v49  ;;  %2579 = vmatprep.subr.mxu1 %v2578_v31  ;;  %v7807_v49 = vand.u32 4294901760, %v7040_v40  ;;  %v2613_v58 = vsub.f32 %v7032_v35, %v7808_v44  ;;  %v7804_v31 = vand.u32 4294901760, %v7075_v14  ;;  %v7803_v37 = vand.u32 4294901760, %v7082_v17 }
 0x28e   : > { %5937 = vmatprep.subr.mxu0 %v7815_v0  ;;  %2585 = vmatpush1.msra.mxu1 %v2584_v38  ;;  %v2631_v38 = vsub.f32 %v7068_v16, %v7805_v7 }
 0x28f   : > { %5938 = vmatpush3.msra.mxu0 %v2078_v55  ;;  %v2602_v55 = vand.u32 4294901760, %v2601_v43  ;;  %v2619_v51 = vsub.f32 %v7040_v40, %v7807_v49  ;;  %v2614_v1 = vand.u32 4294901760, %v2613_v58  ;;  %v2637_v46 = vsub.f32 %v7075_v14, %v7804_v31 }
 0x290   : > { %5939 = vmatprep.subr.mxu0 %v7815_v0  ;;  %v2632_v48 = vand.u32 4294901760, %v2631_v38 }
 0x291   : > { %5940 = vmatpush3.msra.mxu0 %v2085_v61  ;;  %v7059_v61 = vsub.f32 %v2453_v29, %v7047_v45  ;;  %v2620_v3 = vand.u32 4294901760, %v2619_v51  ;;  %v2638_v58 = vand.u32 4294901760, %v2637_v46 }
 0x292   : > { %5942 = vmatmul.mubr.f32.vlgmr.msra.gmra.mxu0 %v6807_v32  ;;  %2483 = vmatprep.subr.mxu0 %v6971_v63  ;;  %v2589_v32 = vsub.f32 %v6989_v27, %v7812_v8 }
 0x293   : > { %2546 = vmatprep.mubr.f32.mxu0 %v7815_v0  ;;  %2485 = vmatpush1.msra.mxu0 %v6973_v4  ;;  %v7806_v5 = vand.u32 4294901760, %v7059_v61 }
 0x294   : > { %2487 = vmatprep.subr.mxu0 %v6978_v10  ;;  %v2590_v42 = vand.u32 4294901760, %v2589_v32  ;;  %v7092_v32 = vsub.f32 %v2449_v53, %v7077_v22  ;;  %v2643_v53 = vsub.f32 %v7082_v17, %v7803_v37 }
 0x295   : > { %2489 = vmatpush1.msra.mxu0 %v6984_v21  ;;  %v2625_v29 = vsub.f32 %v7059_v61, %v7806_v5 }
 0x296   : > { %2491 = vmatprep.subr.mxu0 %v6991_v30  ;;  %2591 = vmatprep.subr.mxu1 %v2590_v42  ;;  %v7104_v42 = vand.u32 4294901760, %v2446_v33 }
 0x297   : > { %2493 = vmatpush1.msra.mxu0 %v7000_v59  ;;  %2597 = vmatpush1.msra.mxu1 %v2596_v47  ;;  %v2626_v43 = vand.u32 4294901760, %v2625_v29  ;;  %v7802_v47 = vand.u32 4294901760, %v7092_v32 }
 0x298   : > { %2495 = vmatprep.subr.mxu0 %v7014_v13  ;;  %2603 = vmatprep.subr.mxu1 %v2602_v55  ;;  %v7801_v55 = vand.u32 4294901760, %v7102_v41  ;;  %v7126_v51 = vsub.f32 %v2446_v33, %v7104_v42 }
 0x299   : > { %2497 = vmatpush1.msra.mxu0 %v7024_v28  ;;  %2609 = vmatpush1.msra.mxu1 %v2608_v11  ;;  %v2649_v6 = vsub.f32 %v7092_v32, %v7802_v47  ;;  %v7123_v11 = vsub.f32 %v2447_v60, %v7094_v36 }
 0x29a   : > { %2499 = vmatprep.subr.mxu0 %v7047_v45  ;;  %2615 = vmatprep.subr.mxu1 %v2614_v1  ;;  %v2644_v1 = vand.u32 4294901760, %v2643_v53  ;;  %v7799_v38 = vand.u32 4294901760, %v7126_v51 }
 0x29b   : > { %2501 = vmatpush1.msra.mxu0 %v7053_v50  ;;  %2621 = vmatpush1.msra.mxu1 %v2620_v3  ;;  %v2655_v3 = vsub.f32 %v7102_v41, %v7801_v55  ;;  %v2650_v29 = vand.u32 4294901760, %v2649_v6  ;;  %v7800_v60 = vand.u32 4294901760, %v7123_v11 }
 0x29c   : > { %2503 = vmatprep.subr.mxu0 %v7061_v2  ;;  %2627 = vmatprep.subr.mxu1 %v2626_v43  ;;  %v2667_v46 = vsub.f32 %v7126_v51, %v7799_v38 }
 0x29d   : > { %2505 = vmatpush1.msra.mxu0 %v7070_v57  ;;  %2633 = vmatpush1.msra.mxu1 %v2632_v48  ;;  %v2656_v33 = vand.u32 4294901760, %v2655_v3  ;;  %v2661_v43 = vsub.f32 %v7123_v11, %v7800_v60  ;;  %v3136_v48 = vpop.permute.xlu0 %3135  ;;  %v3146_v3 = vrot.slane %v7004_v62, 4 }
 0x29e   : > { %2507 = vmatprep.subr.mxu0 %v7077_v22  ;;  %2639 = vmatprep.subr.mxu1 %v2638_v58  ;;  %v3143_v53 = vsel %vm3137_vm3, %v3136_v48, 0.0  ;;  %v2668_v6 = vand.u32 4294901760, %v2667_v46 }
 0x29f   : > { %2509 = vmatpush1.msra.mxu0 %v7084_v20  ;;  %2645 = vmatpush1.msra.mxu1 %v2644_v1  ;;  %v2662_v58 = vand.u32 4294901760, %v2661_v43  ;;  %v7147_v1 = vsel %vm3137_vm3, %v6993_v52, %v3136_v48  ;;  %vm5596_vm3 = vcmask 1042432  }
 0x2a0   : > { %2511 = vmatprep.subr.mxu0 %v7094_v36  ;;  %2651 = vmatprep.subr.mxu1 %v2650_v29  ;;  %v3147_v52 = vrot.slane %v7147_v1, 4  ;;  %v3148_v29 = vrot.slane %v3143_v53, 4 }
 0x2a1   : > { %2513 = vmatpush1.msra.mxu0 %v7104_v42  ;;  %2657 = vmatpush1.msra.mxu1 %v2656_v33  ;;  %v1395_v33 = vld [vmem:[#allocation8 + $0x2] ss:$4 sm:$0x7] }
 0x2a2   : > { %2728 = vmatprep.subr.mxu0 %v6976_v9  ;;  %3208 = vrot.lane.b32.xlu0 %v3143_v53, %s6280_s30  ;;  %v1404_v43 = vrot.slane %v1395_v33, %v6663_v19 }
 0x2a3   : > { %2663 = vmatprep.subr.mxu1 %v2662_v58  ;;  %3228 = vrot.lane.b32.xlu1 %v7147_v1, %s6282_s11 }
 0x2a4   : > { %2669 = vmatpush1.msra.mxu1 %v2668_v6  ;;  %v1400_v6 = vrot.slane %v1395_v33, %v6667_v23 }
 0x2a5   : > { %2832 = vmatprep.subr.mxu1 %v6971_v63 }
 0x2a6   : > { %3215 = vrot.lane.b32.xlu0 %v3146_v3, %s6284_s27 }
 0x2a7   : > { %3230 = vrot.lane.b32.xlu1 %v3143_v53, %s6282_s11  ;;  %s5608_s11 = scalar_lea.sflag [#allocation4], %s6486_s7 }
 0x2aa   : > { %3186 = vrot.lane.b32.xlu0 %v3143_v53, %s6281_s9 }
 0x2ab   : > { %3206 = vrot.lane.b32.xlu1 %v7147_v1, %s6280_s30 }
 0x2ae   : > { %3193 = vrot.lane.b32.xlu0 %v3146_v3, %s6285_s14 }
 0x2af   : > { %3184 = vrot.lane.b32.xlu1 %v7147_v1, %s6281_s9  ;;  %s5620_s9 = scalar_lea.hbm %s7794_s5, %s5762_s12 }
 0x2b2   : > { %3164 = vrot.lane.b32.xlu0 %v3143_v53, %s6283_s8 }
 0x2b3   : > { %3162 = vrot.lane.b32.xlu1 %v7147_v1, %s6283_s8  ;;  %s6190_s8 = scalar_lea.vmem %s5623_s24, 256 }
 0x2b4   : > { %p6191_p12 = scmp.ne.s32.totalorder %s5623_s24, %s6190_s8 }
 0x2b6   : > { %3171 = vrot.lane.b32.xlu0 %v3146_v3, %s6286_s15  ;;  %p6192_p5 = pnand %p6191_p12, %p7868_p0 }
 0x2b7   : > { %3217 = vrot.lane.b32.xlu1 %v3147_v52, %s6284_s27 }
 0x2b8   : > { %p6193_p3 = pneg %p6192_p5 }
 0x2ba   : > { %3219 = vrot.lane.b32.xlu0 %v3148_v29, %s6284_s27  ;;  %s6194_s27 = sshll.u32 %s6291_s22, 4  ;;  %s6195_s27 = int_to_ptr.vmem [resolvable:$false] %s6194_s27 }
 0x2bb   : > { %3195 = vrot.lane.b32.xlu1 %v3147_v52, %s6285_s14  ;;  %p6197_p7 = scmp.lt.s32.totalorder %s5623_s24, %s6195_s27 }
 0x2be   : > { %3197 = vrot.lane.b32.xlu0 %v3148_v29, %s6285_s14  ;;  %s6196_s14 = scalar_lea.vmem %s6195_s27, 512 }
 0x2bf   : > { %3173 = vrot.lane.b32.xlu1 %v3147_v52, %s6286_s15  ;;  %p6198_p9 = scmp.lt.s32.totalorder %s6196_s14, %s6190_s8 }
 0x2c1   : > { %p6199_p8 = por %p6198_p9, %p6197_p7 }
 0x2c2   : > { %3175 = vrot.lane.b32.xlu0 %v3148_v29, %s6286_s15 }
 0x2c3   : > { %3151 = vrot.lane.b32.xlu1 %v3147_v52, %s6287_s17  ;;  %p6200_p10 = pnand %p6199_p8, %p6193_p3 }
 0x2c5   : > { %v3227_v34 = vpop.permute.xlu0 %3226 }
 0x2c6   : > { %3153 = vrot.lane.b32.xlu0 %v3148_v29, %s6287_s17  ;;  %v7162_v29 = vpop.permute.xlu1 %3204 }
 0x2c7   : > { %3149 = vrot.lane.b32.xlu1 %v3146_v3, %s6287_s17 }
 0x2ca   : > { %v7164_v39 = vpop.permute.xlu1 %3182 }
 0x31a   : > { %v1606_v46 = vpop.f32.mrf.mxu1 }
 0x31c   : > { %v1608_v60 = vpop.f32.mrf.mxu1 }
 0x322   : > { %v1777_v55 = vpop.f32.mrf.mxu1 }
 0x323   : > { %v1494_v48 = vpop.f32.mrf.mxu0 }
 0x324   : > { %v1495_v47 = vadd.f32 %v1494_v48, %v1400_v6  ;;  %v1779_v7 = vpop.f32.mrf.mxu1  ;;  %v7168_v6 = vpop.permute.xlu0 %3208 }
 0x325   : > { %v1496_v58 = vpop.f32.mrf.mxu0 }
 0x326   : > { %v1497_v38 = vadd.f32 %v1496_v58, %v1404_v43  ;;  %v1607_v5 = vadd.f32 %v1606_v46, %v1495_v47 }
 0x328   : > { %v1609_v53 = vadd.f32 %v1608_v60, %v1497_v38  ;;  %v7166_v38 = vpop.permute.xlu1 %3160 }
 0x32b   : > { %v1695_v37 = vpop.f32.mrf.mxu0 }
 0x32c   : > { %v1696_v3 = vadd.f32 %v1695_v37, %v1607_v5  ;;  %v1953_v49 = vpop.f32.mrf.mxu1  ;;  %v1407_v5 = vsub.s32 2, %v6660_v18 }
 0x32d   : > { %v1697_v31 = vpop.f32.mrf.mxu0 }
 0x32e   : > { %v1698_v52 = vadd.f32 %v1697_v31, %v1609_v53  ;;  %v1955_v24 = vpop.f32.mrf.mxu1  ;;  %v1778_v8 = vadd.f32 %v1777_v55, %v1696_v3  ;;  %v3229_v53 = vpop.permute.xlu1 %3228 }
 0x32f   : > { %v7173_v3 = vpop.permute.xlu0 %3215 }
 0x330   : > { %v1780_v44 = vadd.f32 %v1779_v7, %v1698_v52  ;;  %v1408_v52 = vrot.slane %v1395_v33, %v1407_v5  ;;  %v3233_v5 = vsel %vm3232_vm6, %v3227_v34, %v3229_v53 }
 0x332   : > { %v3231_v54 = vpop.permute.xlu1 %3230 }
 0x335   : > { %v1873_v43 = vpop.f32.mrf.mxu0 }
 0x336   : > { %v1874_v58 = vadd.f32 %v1873_v43, %v1778_v8  ;;  %v2124_v60 = vpop.f32.mrf.mxu1 }
 0x337   : > { %v1875_v48 = vpop.f32.mrf.mxu0 }
 0x338   : > { %v1954_v47 = vadd.f32 %v1953_v49, %v1874_v58  ;;  %v1876_v31 = vadd.f32 %v1875_v48, %v1780_v44  ;;  %v5910_v46 = vpop.f32.mrf.mxu1 }
 0x339   : > { %v3254_v46 = vld [vmem:[#allocation10 + $0x40] sm:$0xf] }
 0x33a   : > { %vm2443_vm4 = vcmp.gt.f32.partialorder %v1954_v47, 0.0  ;;  %v2444_v7 = vmul.f32 0.2, %v1954_v47  ;;  %v7171_v37 = vadd.f32 %v1955_v24, %v1876_v31  ;;  %v7183_v24 = vpop.permute.xlu0 %3186 }
 0x33c   : > { %7841 = vst [vmem:[#allocation19_spill] sm:$0xff] %v7171_v37  ;;  %v2445_v55 = vsel %vm2443_vm4, %v1954_v47, %v2444_v7  ;;  %v3207_v47 = vpop.permute.xlu1 %3206  ;;  %v3255_v7 = vld [vmem:[#allocation10 + $0x48] sm:$0xf]  ;;  %v3253_v37 = vld [vmem:[#allocation10 + $0x38] sm:$0xff] }
 0x33d   : > { %v2464_v8 = vsel %vm2462_vm5, %v2445_v55, 0  ;;  %v3234_v55 = vsel %vm3232_vm6, %v3229_v53, %v3231_v54 }
 0x33e   : > { %v7175_v43 = vand.u32 4294901760, %v2464_v8 }
 0x33f   : > { %v2033_v26 = vpop.f32.mrf.mxu0 }
 0x340   : > { %v2034_v49 = vadd.f32 %v2033_v26, %v1408_v52  ;;  %v2281_v44 = vpop.f32.mrf.mxu1  ;;  %2704 = vmatmul.mubr.f32.vlgmr.msra.gmra.mxu1 %v7175_v43  ;;  %v7179_v18 = vsub.f32 %v2464_v8, %v7175_v43  ;;  %v7191_v52 = vpop.permute.xlu0 %3193 }
 0x341   : > { %v5899_v58 = vpop.f32.mrf.mxu0  ;;  %2834 = vmatpush1.msra.mxu1 %v6973_v4  ;;  %2895 = vmatprep.mubr.f32.mxu1 %v7815_v0  ;;  %v7194_v8 = vpop.permute.xlu1 %3184 }
 0x342   : > { %v5932_v33 = vpop.f32.mrf.mxu1  ;;  %2836 = vmatprep.subr.mxu1 %v6978_v10  ;;  %v2125_v48 = vadd.f32 %v2124_v60, %v2034_v49  ;;  %v2549_v26 = vand.u32 4294901760, %v7179_v18  ;;  %v3264_v49 = vmul.f32 %v3254_v46, %v3233_v5  ;;  %v3265_v58 = vmul.f32 %v3255_v7, %v3234_v55 }
 0x343   : > { %2838 = vmatpush1.msra.mxu1 %v6984_v21  ;;  %v3189_v0 = vsel %vm3188_vm10, %v7164_v39, %v7194_v8 }
 0x344   : > { %2840 = vmatprep.subr.mxu1 %v6991_v30  ;;  %v2550_v31 = vsub.f32 %v7179_v18, %v2549_v26  ;;  %v7200_v54 = vpop.permute.xlu0 %3164  ;;  %v3271_v5 = vsel %vm3237_vm7, %v3264_v49, 0  ;;  %v3274_v7 = vsel %vm3237_vm7, %v3265_v58, 0 }
 0x345   : > { %2842 = vmatpush1.msra.mxu1 %v7000_v59  ;;  %v7220_v49 = vand.u32 4294901760, %v3271_v5  ;;  %v7222_v58 = vand.u32 4294901760, %v3274_v7 }
 0x346   : > { %2844 = vmatprep.subr.mxu1 %v7014_v13  ;;  %v2551_v60 = vand.u32 4294901760, %v2550_v31  ;;  %v7204_v31 = vpop.permute.xlu1 %3162 }
 0x347   : > { %2846 = vmatpush1.msra.mxu1 %v7024_v28 }
 0x348   : > { %2848 = vmatprep.subr.mxu1 %v7047_v45  ;;  %2552 = vmatmul.mubr.f32.vlgmr.msra.gmra.mxu0 %v2551_v60  ;;  %v3211_v60 = vsel %vm3210_vm8, %v7162_v29, %v3207_v47 }
 0x349   : > { %v2204_v34 = vpop.f32.mrf.mxu0  ;;  %2731 = vmatpush1.msra.mxu0 %v6982_v15  ;;  %2850 = vmatpush1.msra.mxu1 %v7053_v50 }
 0x34a   : > { %v2205_v53 = vadd.f32 %v2204_v34, %v2125_v48  ;;  %v2439_v33 = vpop.f32.mrf.mxu1  ;;  %2734 = vmatprep.subr.mxu0 %v6989_v27  ;;  %2852 = vmatprep.subr.mxu1 %v7061_v2  ;;  %v7216_v34 = vpop.permute.xlu0 %3171 }
 0x34b   : > { %v5921_v46 = vpop.f32.mrf.mxu0  ;;  %2737 = vmatpush1.msra.mxu0 %v6998_v56  ;;  %2854 = vmatpush1.msra.mxu1 %v7070_v57 }
 0x34c   : > { %v5954_v55 = vpop.f32.mrf.mxu1  ;;  %2740 = vmatprep.subr.mxu0 %v7012_v12  ;;  %2856 = vmatprep.subr.mxu1 %v7077_v22  ;;  %v2282_v48 = vadd.f32 %v2281_v44, %v2205_v53  ;;  %v3252_v44 = vld [vmem:[#allocation10 + $0x30] sm:$0xff]  ;;  %v3218_v53 = vpop.permute.xlu1 %3217  ;;  %v3212_v46 = vsel %vm3210_vm8, %v3207_v47, %v7168_v6  ;;  %v7240_v6 = vsub.f32 %v3271_v5, %v7220_v49  ;;  %v3250_v47 = vld [vmem:[#allocation10 + $0x20] sm:$0xff] }
 0x34d   : > { %2743 = vmatpush1.msra.mxu0 %v7022_v25  ;;  %2858 = vmatpush1.msra.mxu1 %v7084_v20  ;;  %v3222_v29 = vsel %vm3221_vm9, %v7173_v3, %v3218_v53 }
 0x34e   : > { %2746 = vmatprep.subr.mxu0 %v7032_v35  ;;  %2860 = vmatprep.subr.mxu1 %v7094_v36  ;;  %v3244_v55 = vsel %vm3237_vm7, %v3211_v60, %v3222_v29  ;;  %v3220_v3 = vpop.permute.xlu0 %3219 }
 0x34f   : > { %2749 = vmatpush1.msra.mxu0 %v7040_v40  ;;  %2862 = vmatpush1.msra.mxu1 %v7104_v42  ;;  %v3262_v19 = vmul.f32 %v3252_v44, %v3244_v55  ;;  %v7843_v55 = vmov 0.0  }
 0x350   : > { %2752 = vmatprep.subr.mxu0 %v7059_v61  ;;  %2899 = vmatmul.mubr.f32.vlgmr.msra.gmra.mxu1 %v2549_v26  ;;  %v7243_v26 = vsub.f32 %v3274_v7, %v7222_v58  ;;  %v3196_v60 = vpop.permute.xlu1 %3195 }
 0x351   : > { %3042 = vmatprep.subr.mxu1 %v6971_v63  ;;  %2755 = vmatpush1.msra.mxu0 %v7068_v16  ;;  %v3223_v63 = vsel %vm3221_vm9, %v3218_v53, %v3220_v3  ;;  %v7248_v44 = vand.u32 4294901760, %v3262_v19  ;;  %v3200_v5 = vsel %vm3199_vm11, %v7191_v52, %v3196_v60  ;;  %v3251_v53 = vld [vmem:[#allocation10 + $0x28] sm:$0xff] }
 0x352   : > { %v2364_v23 = vpop.f32.mrf.mxu0  ;;  %3044 = vmatpush1.msra.mxu1 %v6973_v4  ;;  %2758 = vmatprep.subr.mxu0 %v7075_v14  ;;  %7842 = vst [vmem:[#allocation20_spill] sm:$0xff] %v7243_v26  ;;  %v3245_v4 = vsel %vm3237_vm7, %v3212_v46, %v3223_v63  ;;  %v3198_v46 = vpop.permute.xlu0 %3197 }
 0x353   : > { %v2365_v39 = vadd.f32 %v2364_v23, %v2282_v48  ;;  %3046 = vmatprep.subr.mxu1 %v6978_v10  ;;  %2761 = vmatpush1.msra.mxu0 %v7082_v17  ;;  %v3190_v23 = vsel %vm3188_vm10, %v7194_v8, %v7183_v24  ;;  %v3263_v7 = vmul.f32 %v3253_v37, %v3245_v4  ;;  %v3248_v24 = vld [vmem:[#allocation10 + $0x10] sm:$0xff]  ;;  %v7300_v4 = vand.u32 4294901760, %v7240_v6 }
 0x354   : > { %v5943_v29 = vpop.f32.mrf.mxu0  ;;  %3048 = vmatpush1.msra.mxu1 %v6984_v21  ;;  %2764 = vmatprep.subr.mxu0 %v7092_v32  ;;  %v3242_v10 = vsel %vm3237_vm7, %v3189_v0, %v3200_v5  ;;  %v3167_v21 = vsel %vm3166_vm12, %v7166_v38, %v7204_v31  ;;  %v3168_v0 = vsel %vm3166_vm12, %v7204_v31, %v7200_v54  ;;  %v3174_v8 = vpop.permute.xlu1 %3173 }
 0x355   : > { %v7259_v48 = vadd.f32 %v2439_v33, %v2365_v39  ;;  %3050 = vmatprep.subr.mxu1 %v6991_v30  ;;  %2767 = vmatpush1.msra.mxu0 %v7102_v41  ;;  %v3260_v52 = vmul.f32 %v3250_v47, %v3242_v10  ;;  %v7271_v37 = vand.u32 4294901760, %v3263_v7  ;;  %v3201_v30 = vsel %vm3199_vm11, %v3196_v60, %v3198_v46  ;;  %v3247_v46 = vld [vmem:[#allocation10 + $0x8] sm:$0xff] }
 0x356   : > { %3052 = vmatpush1.msra.mxu1 %v7000_v59  ;;  %2770 = vmatprep.subr.mxu0 %v7123_v11  ;;  %v7275_v33 = vand.u32 4294901760, %v7243_v26  ;;  %v7280_v59 = vsub.f32 %v3262_v19, %v7248_v44  ;;  %v3243_v54 = vsel %vm3237_vm7, %v3190_v23, %v3201_v30  ;;  %v3178_v31 = vsel %vm3177_vm13, %v7216_v34, %v3174_v8  ;;  %v3249_v34 = vld [vmem:[#allocation10 + $0x18] sm:$0xff]  ;;  %v3176_v39 = vpop.permute.xlu0 %3175 }
 0x357   : > { %3054 = vmatprep.subr.mxu1 %v7014_v13  ;;  %2773 = vmatpush1.msra.mxu0 %v7126_v51  ;;  %v7282_v38 = vand.u32 4294901760, %v3260_v52  ;;  %v7290_v3 = vsub.f32 %v3263_v7, %v7271_v37  ;;  %v3261_v13 = vmul.f32 %v3251_v53, %v3243_v54  ;;  %v3240_v63 = vsel %vm3237_vm7, %v3167_v21, %v3178_v31 }
 0x358   : > { %2806 = vmatprep.mubr.f32.mxu0 %v7843_v55  ;;  %3056 = vmatpush1.msra.mxu1 %v7024_v28  ;;  %v7844_v19 = vand.u32 4294901760, %v6976_v9  ;;  %v3258_v60 = vmul.f32 %v3248_v24, %v3240_v63  ;;  %v7845_v28 = vand.u32 4294901760, %v6982_v15  ;;  %v3152_v9 = vpop.permute.xlu1 %3151  ;;  %v7846_v23 = vand.u32 4294901760, %v6989_v27  ;;  %v3246_v24 = vld [vmem:[#allocation10] sm:$0xff] }
 0x359   : > { %2809 = vmatmul.mubr.f32.vlgmr.msra.gmra.mxu0 %v7179_v18  ;;  %v7297_v47 = vsub.f32 %v3260_v52, %v7282_v38  ;;  %3058 = vmatprep.subr.mxu1 %v7047_v45  ;;  %v7305_v5 = vand.u32 4294901760, %v3261_v13  ;;  %v3179_v18 = vsel %vm3177_vm13, %v3174_v8, %v3176_v39  ;;  %v7309_v29 = vand.u32 4294901760, %v7290_v3 }
 0x35a   : > { %2924 = vmatprep.subr.mxu0 %v7844_v19  ;;  %3060 = vmatpush1.msra.mxu1 %v7053_v50  ;;  %v7314_v7 = vand.u32 4294901760, %v3258_v60  ;;  %v3241_v45 = vsel %vm3237_vm7, %v3168_v0, %v3179_v18  ;;  %v3387_v15 = vsub.f32 %v7243_v26, %v7275_v33  ;;  %v7320_v10 = vand.u32 4294901760, %v7280_v59  ;;  %v3154_v0 = vpop.permute.xlu0 %3153 }
 0x35b   : > { %2928 = vmatpush1.msra.mxu0 %v7845_v28  ;;  %3062 = vmatprep.subr.mxu1 %v7061_v2  ;;  %v7847_v21 = vand.u32 4294901760, %v6998_v56  ;;  %v7326_v50 = vsub.f32 %v3261_v13, %v7305_v5  ;;  %v3259_v27 = vmul.f32 %v3249_v34, %v3241_v45  ;;  %v7848_v52 = vand.u32 4294901760, %v7012_v12 }
 0x35c   : > { %2932 = vmatprep.subr.mxu0 %v7846_v23  ;;  %3064 = vmatpush1.msra.mxu1 %v7070_v57  ;;  %v7332_v53 = vsub.f32 %v3258_v60, %v7314_v7  ;;  %v3393_v2 = vsub.f32 %v7240_v6, %v7300_v4  ;;  %v7337_v56 = vand.u32 4294901760, %v7297_v47  ;;  %v7849_v30 = vand.u32 4294901760, %v7022_v25  ;;  %v3150_v8 = vpop.permute.xlu1 %3149 }
 0x35d   : > { %2936 = vmatpush1.msra.mxu0 %v7847_v21  ;;  %3066 = vmatprep.subr.mxu1 %v7077_v22  ;;  %v7342_v57 = vand.u32 4294901760, %v3259_v27  ;;  %v3157_v12 = vsel %vm3155_vm14, %v3152_v9, %v3154_v0  ;;  %v3399_v54 = vsub.f32 %v7290_v3, %v7309_v29  ;;  %v7348_v31 = vand.u32 4294901760, %v7326_v50 }
 0x35e   : > { %2940 = vmatprep.subr.mxu0 %v7848_v52  ;;  %3068 = vmatpush1.msra.mxu1 %v7084_v20  ;;  %v7850_v13 = vand.u32 4294901760, %v7032_v35  ;;  %v3239_v25 = vsel %vm3237_vm7, %v7147_v1, %v3157_v12  ;;  %v3156_v22 = vsel %vm3155_vm14, %v3150_v8, %v3152_v9  ;;  %v7356_v63 = vand.u32 4294901760, %v3387_v15 }
 0x35f   : > { %2944 = vmatpush1.msra.mxu0 %v7849_v30  ;;  %v3405_v19 = vsub.f32 %v7280_v59, %v7320_v10  ;;  %3070 = vmatprep.subr.mxu1 %v7094_v36  ;;  %v7851_v60 = vand.u32 4294901760, %v7040_v40  ;;  %v7364_v20 = vsub.f32 %v3259_v27, %v7342_v57  ;;  %v3257_v35 = vmul.f32 %v3247_v46, %v3239_v25 }
 0x360   : > { %2948 = vmatprep.subr.mxu0 %v7850_v13  ;;  %v3238_v34 = vsel %vm3237_vm7, %v7004_v62, %v3156_v22  ;;  %v7369_v1 = vand.u32 4294901760, %v7332_v53  ;;  %3072 = vmatpush1.msra.mxu1 %v7104_v42  ;;  %v7373_v28 = vand.u32 4294901760, %v3393_v2  ;;  %v3411_v40 = vsub.f32 %v7326_v50, %v7348_v31 }
 0x361   : > { %2952 = vmatpush1.msra.mxu0 %v7851_v60  ;;  %3105 = vmatprep.mubr.f32.mxu1 %v7843_v55  ;;  %v3256_v39 = vmul.f32 %v3246_v24, %v3238_v34  ;;  %v3417_v36 = vsub.f32 %v7297_v47, %v7337_v56  ;;  %v7852_v18 = vand.u32 4294901760, %v7059_v61  ;;  %v7382_v62 = vand.u32 4294901760, %v3257_v35 }
 0x362   : > { %3107 = vmatmul.mubr.f32.vlgmr.msra.gmra.mxu1 %v7175_v43  ;;  %v7384_v9 = vand.u32 4294901760, %v3399_v54  ;;  %v7387_v42 = vand.u32 4294901760, %v7364_v20  ;;  %v7853_v23 = vand.u32 4294901760, %v7068_v16  ;;  %3017 = vmatprep.mubr.f32.mxu0 %v7843_v55  ;;  %v7394_v15 = vand.u32 4294901760, %v3405_v19 }
 0x363   : > { %2956 = vmatprep.subr.mxu0 %v7852_v18  ;;  %v7392_v45 = vand.u32 4294901760, %v3256_v39  ;;  %v7854_v61 = vand.u32 4294901760, %v7075_v14  ;;  %v7399_v21 = vsub.f32 %v3257_v35, %v7382_v62  ;;  %3389 = vmatprep.subr.mxu1 %v7356_v63  ;;  %v7402_v27 = vand.u32 4294901760, %v3411_v40 }
 0x364   : > { %2960 = vmatpush1.msra.mxu0 %v7853_v23  ;;  %v3423_v16 = vsub.f32 %v7364_v20, %v7387_v42  ;;  %v3429_v52 = vsub.f32 %v7332_v53, %v7369_v1  ;;  %v7855_v46 = vand.u32 4294901760, %v7082_v17  ;;  %3395 = vmatpush1.msra.mxu1 %v7373_v28  ;;  %v7414_v14 = vand.u32 4294901760, %v3417_v36 }
 0x365   : > { %2964 = vmatprep.subr.mxu0 %v7854_v61  ;;  %v7411_v0 = vsub.f32 %v3256_v39, %v7392_v45  ;;  %v7856_v2 = vand.u32 4294901760, %v7092_v32  ;;  %3401 = vmatprep.subr.mxu1 %v7384_v9  ;;  %v7420_v30 = vand.u32 4294901760, %v7399_v21  ;;  %v7857_v12 = vand.u32 4294901760, %v7102_v41 }
 0x366   : > { %2968 = vmatpush1.msra.mxu0 %v7855_v46  ;;  %3407 = vmatpush1.msra.mxu1 %v7394_v15  ;;  %v7425_v17 = vand.u32 4294901760, %v3423_v16  ;;  %v7858_v8 = vand.u32 4294901760, %v7123_v11  ;;  %v7433_v32 = vand.u32 4294901760, %v3429_v52  ;;  %v7859_v41 = vand.u32 4294901760, %v7126_v51 }
 0x367   : > { %2972 = vmatprep.subr.mxu0 %v7856_v2  ;;  %v7428_v24 = vand.u32 4294901760, %v7411_v0  ;;  %3413 = vmatprep.subr.mxu1 %v7402_v27  ;;  %v3435_v54 = vsub.f32 %v7399_v21, %v7420_v30  ;;  %v3116_v46 = vld [vmem:[#allocation8 + $0x3] ss:$4 sm:$0x3] }
 0x368   : > { %2976 = vmatpush1.msra.mxu0 %v7857_v12  ;;  %3419 = vmatpush1.msra.mxu1 %v7414_v14 }
 0x369   : > { %2980 = vmatprep.subr.mxu0 %v7858_v8  ;;  %v3441_v13 = vsub.f32 %v7411_v0, %v7428_v24  ;;  %v7444_v11 = vand.u32 4294901760, %v3435_v54  ;;  %3425 = vmatprep.subr.mxu1 %v7425_v17 }
 0x36a   : > { %2984 = vmatpush1.msra.mxu0 %v7859_v41  ;;  %3431 = vmatpush1.msra.mxu1 %v7433_v32  ;;  %v7862_v41 = vld [vmem:[#allocation18_spill] sm:$0xff] }
 0x36b   : > { %3019 = vmatmul.mubr.f32.vlgmr.msra.gmra.mxu0 %v7175_v43  ;;  %3299 = vmatprep.subr.mxu0 %v7222_v58  ;;  %7860 = vst [vmem:[#allocation21_spill] sm:$0xff] %v7444_v11  ;;  %v7448_v25 = vand.u32 4294901760, %v3441_v13  ;;  %v3121_v13 = vrot.slane %v3116_v46, %v7862_v41 }
 0x36c   : > { %3301 = vmatpush1.msra.mxu0 %v7220_v49  ;;  %3437 = vmatprep.subr.mxu1 %v7444_v11  ;;  %v7863_v11 = vld [vmem:[#allocation19_spill] sm:$0xff] }
 0x36d   : > { %7861 = vst [vmem:[#allocation22_spill] sm:$0xff] %v7448_v25  ;;  %3303 = vmatprep.subr.mxu0 %v7271_v37  ;;  %3443 = vmatpush1.msra.mxu1 %v7448_v25 }
 0x36e   : > { %3305 = vmatpush1.msra.mxu0 %v7248_v44  ;;  %3476 = vmatprep.mubr.f32.mxu1 %v7843_v55 }
 0x36f   : > { %3307 = vmatprep.subr.mxu0 %v7305_v5  ;;  %3600 = vmatprep.subr.mxu1 %v7222_v58 }
 0x370   : > { %3309 = vmatpush1.msra.mxu0 %v7282_v38  ;;  %3350 = vmatprep.mubr.f32.mxu0 %v7843_v55 }
 0x371   : > { %3311 = vmatprep.subr.mxu0 %v7342_v57 }
 0x372   : > { %3313 = vmatpush1.msra.mxu0 %v7314_v7 }
 0x373   : > { %3315 = vmatprep.subr.mxu0 %v7382_v62 }
 0x374   : > { %3317 = vmatpush1.msra.mxu0 %v7392_v45 }
 0x375   : > { %3508 = vmatprep.subr.mxu0 %v7243_v26 }
 0x400   : > { %v2705_v43 = vpop.f32.mrf.mxu1 }
 0x402   : > { %v2707_v60 = vpop.f32.mrf.mxu1 }
 0x408   : > { %v2553_v51 = vpop.f32.mrf.mxu0 }
 0x409   : > { %v2706_v35 = vadd.f32 %v2705_v43, %v2553_v51 }
 0x40a   : > { %v2555_v22 = vpop.f32.mrf.mxu0 }
 0x40b   : > { %v2708_v40 = vadd.f32 %v2707_v60, %v2555_v22  ;;  %v7864_v60 = vld [vmem:[#allocation17_spill] sm:$0xff] }
 0x410   : > { %v2900_v34 = vpop.f32.mrf.mxu1 }
 0x412   : > { %v2902_v23 = vpop.f32.mrf.mxu1 }
 0x419   : > { %v2810_v19 = vpop.f32.mrf.mxu0 }
 0x41a   : > { %v2811_v36 = vadd.f32 %v2810_v19, %v2706_v35  ;;  %v3125_v35 = vrot.slane %v3116_v46, %v7864_v60 }
 0x41b   : > { %v2812_v39 = vpop.f32.mrf.mxu0 }
 0x41c   : > { %v2813_v18 = vadd.f32 %v2812_v39, %v2708_v40  ;;  %v2901_v61 = vadd.f32 %v2900_v34, %v2811_v36  ;;  %v7865_v36 = vld [vmem:[#allocation21_spill] sm:$0xff] }
 0x41e   : > { %v2903_v12 = vadd.f32 %v2902_v23, %v2813_v18  ;;  %v7866_v18 = vld [vmem:[#allocation22_spill] sm:$0xff]  ;;  %v7867_v23 = vld [vmem:[#allocation20_spill] sm:$0xff] }
 0x422   : > { %v3108_v16 = vpop.f32.mrf.mxu1 }
 0x424   : > { %v3110_v25 = vpop.f32.mrf.mxu1 }
 0x42b   : > { %v3020_v52 = vpop.f32.mrf.mxu0 }
 0x42c   : > { %v3021_v2 = vadd.f32 %v3020_v52, %v2901_v61 }
 0x42d   : > { %v3022_v8 = vpop.f32.mrf.mxu0 }
 0x42e   : > { %v3109_v54 = vadd.f32 %v3108_v16, %v3021_v2  ;;  %v3023_v26 = vadd.f32 %v3022_v8, %v2903_v12 }
 0x430   : > { %v3113_v51 = vadd.f32 %v3109_v54, %v7863_v11  ;;  %v3111_v43 = vadd.f32 %v3110_v25, %v3023_v26 }
 0x432   : > { %v3128_v22 = vadd.f32 %v3121_v13, %v3113_v51  ;;  %v3114_v19 = vadd.f32 %v3111_v43, %v7259_v48 }
 0x434   : > { %4418 = vrot.lane.b32.xlu1 %v3128_v22, %s6288_s28  ;;  %3845 = vrot.lane.b32.xlu0 %v3128_v22, %s6289_s26  ;;  %v3268_v34 = vsel %vm3266_vm15, %v3128_v22, 0  ;;  %v3129_v11 = vadd.f32 %v3125_v35, %v3114_v19 }
 0x435   : > { %v7470_v39 = vand.u32 4294901760, %v3268_v34 }
 0x437   : > { %v3352_v40 = vsub.f32 %v3268_v34, %v7470_v39  ;;  %3478 = vmatmul.mubr.f32.vlgmr.msra.gmra.mxu1 %v7470_v39 }
 0x438   : > { %3602 = vmatpush1.msra.mxu1 %v7220_v49  ;;  %4992 = vrot.lane.b32.xlu0 %v3128_v22, %s6290_s23 }
 0x439   : > { %3604 = vmatprep.subr.mxu1 %v7271_v37  ;;  %4994 = vrot.lane.b32.xlu1 %v3129_v11, %s6290_s23  ;;  %v3353_v26 = vand.u32 4294901760, %v3352_v40 }
 0x43a   : > { %3606 = vmatpush1.msra.mxu1 %v7248_v44  ;;  %3651 = vmatprep.mubr.f32.mxu1 %v7843_v55 }
 0x43b   : > { %3608 = vmatprep.subr.mxu1 %v7305_v5  ;;  %v3354_v48 = vsub.f32 %v3352_v40, %v3353_v26 }
 0x43c   : > { %3610 = vmatpush1.msra.mxu1 %v7282_v38 }
 0x43d   : > { %3612 = vmatprep.subr.mxu1 %v7342_v57  ;;  %v3355_v25 = vand.u32 4294901760, %v3354_v48 }
 0x43e   : > { %3614 = vmatpush1.msra.mxu1 %v7314_v7 }
 0x43f   : > { %3616 = vmatprep.subr.mxu1 %v7382_v62  ;;  %3356 = vmatmul.mubr.f32.vlgmr.msra.gmra.mxu0 %v3355_v25 }
 0x440   : > { %3511 = vmatpush1.msra.mxu0 %v7240_v6  ;;  %3618 = vmatpush1.msra.mxu1 %v7392_v45 }
 0x441   : > { %3514 = vmatprep.subr.mxu0 %v7290_v3  ;;  %3655 = vmatmul.mubr.f32.vlgmr.msra.gmra.mxu1 %v3353_v26 }
 0x442   : > { %3786 = vmatprep.subr.mxu1 %v7222_v58  ;;  %3517 = vmatpush1.msra.mxu0 %v7280_v59 }
 0x443   : > { %3788 = vmatpush1.msra.mxu1 %v7220_v49  ;;  %3520 = vmatprep.subr.mxu0 %v7326_v50 }
 0x444   : > { %3790 = vmatprep.subr.mxu1 %v7271_v37  ;;  %3523 = vmatpush1.msra.mxu0 %v7297_v47 }
 0x445   : > { %3792 = vmatpush1.msra.mxu1 %v7248_v44  ;;  %3526 = vmatprep.subr.mxu0 %v7364_v20 }
 0x446   : > { %3794 = vmatprep.subr.mxu1 %v7305_v5  ;;  %3529 = vmatpush1.msra.mxu0 %v7332_v53 }
 0x447   : > { %3796 = vmatpush1.msra.mxu1 %v7282_v38  ;;  %3532 = vmatprep.subr.mxu0 %v7399_v21 }
 0x448   : > { %3798 = vmatprep.subr.mxu1 %v7342_v57  ;;  %3535 = vmatpush1.msra.mxu0 %v7411_v0 }
 0x449   : > { %3568 = vmatprep.mubr.f32.mxu0 %v7843_v55  ;;  %3800 = vmatpush1.msra.mxu1 %v7314_v7 }
 0x44a   : > { %3571 = vmatmul.mubr.f32.vlgmr.msra.gmra.mxu0 %v3352_v40  ;;  %3686 = vmatprep.subr.mxu0 %v7275_v33 }
 0x44b   : > { %3802 = vmatprep.subr.mxu1 %v7382_v62  ;;  %3690 = vmatpush1.msra.mxu0 %v7300_v4 }
 0x44c   : > { %3804 = vmatpush1.msra.mxu1 %v7392_v45  ;;  %3837 = vmatprep.mubr.f32.mxu1 %v7843_v55 }
 0x44d   : > { %3694 = vmatprep.subr.mxu0 %v7309_v29  ;;  %3839 = vmatmul.mubr.f32.vlgmr.msra.gmra.mxu1 %v7470_v39 }
 0x44e   : > { %3962 = vmatprep.subr.mxu1 %v7356_v63  ;;  %3698 = vmatpush1.msra.mxu0 %v7320_v10 }
 0x44f   : > { %3968 = vmatpush1.msra.mxu1 %v7373_v28  ;;  %3702 = vmatprep.subr.mxu0 %v7348_v31 }
 0x450   : > { %3974 = vmatprep.subr.mxu1 %v7384_v9  ;;  %3706 = vmatpush1.msra.mxu0 %v7337_v56 }
 0x451   : > { %3980 = vmatpush1.msra.mxu1 %v7394_v15  ;;  %3710 = vmatprep.subr.mxu0 %v7387_v42 }
 0x452   : > { %3986 = vmatprep.subr.mxu1 %v7402_v27  ;;  %3714 = vmatpush1.msra.mxu0 %v7369_v1 }
 0x453   : > { %3992 = vmatpush1.msra.mxu1 %v7414_v14  ;;  %3718 = vmatprep.subr.mxu0 %v7420_v30 }
 0x454   : > { %3998 = vmatprep.subr.mxu1 %v7425_v17  ;;  %3722 = vmatpush1.msra.mxu0 %v7428_v24 }
 0x455   : > { %3755 = vmatprep.mubr.f32.mxu0 %v7843_v55  ;;  %4004 = vmatpush1.msra.mxu1 %v7433_v32 }
 0x456   : > { %3757 = vmatmul.mubr.f32.vlgmr.msra.gmra.mxu0 %v7470_v39  ;;  %3872 = vmatprep.subr.mxu0 %v7222_v58 }
 0x457   : > { %4010 = vmatprep.subr.mxu1 %v7865_v36  ;;  %3874 = vmatpush1.msra.mxu0 %v7220_v49 }
 0x458   : > { %4016 = vmatpush1.msra.mxu1 %v7866_v18  ;;  %3876 = vmatprep.subr.mxu0 %v7271_v37 }
 0x459   : > { %3878 = vmatpush1.msra.mxu0 %v7248_v44  ;;  %4173 = vmatprep.subr.mxu1 %v7222_v58 }
 0x45a   : > { %3880 = vmatprep.subr.mxu0 %v7305_v5  ;;  %4049 = vmatprep.mubr.f32.mxu1 %v7843_v55 }
 0x45b   : > { %3882 = vmatpush1.msra.mxu0 %v7282_v38  ;;  %3923 = vmatprep.mubr.f32.mxu0 %v7843_v55 }
 0x45c   : > { %3884 = vmatprep.subr.mxu0 %v7342_v57 }
 0x45d   : > { %3886 = vmatpush1.msra.mxu0 %v7314_v7 }
 0x45e   : > { %3888 = vmatprep.subr.mxu0 %v7382_v62 }
 0x45f   : > { %3890 = vmatpush1.msra.mxu0 %v7392_v45 }
 0x460   : > { %4081 = vmatprep.subr.mxu0 %v7867_v23 }
 0x4a6   : > { %v3846_v61 = vpop.permute.xlu0 %3845  ;;  %v4419_v54 = vpop.permute.xlu1 %4418 }
 0x4a7   : > { %v3847_v16 = vsel %vm3266_vm15, %v3846_v61, 0  ;;  %v4420_v41 = vsel %vm3266_vm15, %v4419_v54, 0 }
 0x4a8   : > { %v7543_v52 = vand.u32 4294901760, %v3847_v16  ;;  %v7587_v13 = vand.u32 4294901760, %v4420_v41 }
 0x4aa   : > { %v3925_v46 = vsub.f32 %v3847_v16, %v7543_v52  ;;  %4051 = vmatmul.mubr.f32.vlgmr.msra.gmra.mxu1 %v7543_v52  ;;  %v4498_v51 = vsub.f32 %v4420_v41, %v7587_v13  ;;  %v4993_v60 = vpop.permute.xlu0 %4992 }
 0x4ab   : > { %4175 = vmatpush1.msra.mxu1 %v7220_v49  ;;  %4224 = vmatprep.mubr.f32.mxu1 %v7843_v55  ;;  %v4995_v35 = vpop.permute.xlu1 %4994 }
 0x4ac   : > { %v3926_v2 = vand.u32 4294901760, %v3925_v46  ;;  %4177 = vmatprep.subr.mxu1 %v7271_v37  ;;  %v4499_v43 = vand.u32 4294901760, %v4498_v51  ;;  %v4997_v34 = vsel %vm4996_vm0, %v4993_v60, %v4995_v35 }
 0x4ad   : > { %4179 = vmatpush1.msra.mxu1 %v7248_v44  ;;  %v4998_v39 = vsel %vm3266_vm15, %v4997_v34, 0 }
 0x4ae   : > { %v3927_v12 = vsub.f32 %v3925_v46, %v3926_v2  ;;  %4181 = vmatprep.subr.mxu1 %v7305_v5  ;;  %v4500_v22 = vsub.f32 %v4498_v51, %v4499_v43  ;;  %v7660_v40 = vand.u32 4294901760, %v4998_v39 }
 0x4af   : > { %4183 = vmatpush1.msra.mxu1 %v7282_v38 }
 0x4b0   : > { %v3928_v8 = vand.u32 4294901760, %v3927_v12  ;;  %4185 = vmatprep.subr.mxu1 %v7342_v57  ;;  %v4501_v19 = vand.u32 4294901760, %v4500_v22 }
 0x4b1   : > { %4187 = vmatpush1.msra.mxu1 %v7314_v7 }
 0x4b2   : > { %4189 = vmatprep.subr.mxu1 %v7382_v62  ;;  %3929 = vmatmul.mubr.f32.vlgmr.msra.gmra.mxu0 %v3928_v8 }
 0x4b3   : > { %4084 = vmatpush1.msra.mxu0 %v7240_v6  ;;  %4191 = vmatpush1.msra.mxu1 %v7392_v45 }
 0x4b4   : > { %4087 = vmatprep.subr.mxu0 %v7290_v3  ;;  %4228 = vmatmul.mubr.f32.vlgmr.msra.gmra.mxu1 %v3926_v2 }
 0x4b5   : > { %4359 = vmatprep.subr.mxu1 %v7222_v58  ;;  %4090 = vmatpush1.msra.mxu0 %v7280_v59 }
 0x4b6   : > { %4361 = vmatpush1.msra.mxu1 %v7220_v49  ;;  %4093 = vmatprep.subr.mxu0 %v7326_v50 }
 0x4b7   : > { %4363 = vmatprep.subr.mxu1 %v7271_v37  ;;  %4096 = vmatpush1.msra.mxu0 %v7297_v47 }
 0x4b8   : > { %4365 = vmatpush1.msra.mxu1 %v7248_v44  ;;  %4099 = vmatprep.subr.mxu0 %v7364_v20 }
 0x4b9   : > { %4367 = vmatprep.subr.mxu1 %v7305_v5  ;;  %4102 = vmatpush1.msra.mxu0 %v7332_v53 }
 0x4ba   : > { %4369 = vmatpush1.msra.mxu1 %v7282_v38  ;;  %4105 = vmatprep.subr.mxu0 %v7399_v21 }
 0x4bb   : > { %4371 = vmatprep.subr.mxu1 %v7342_v57  ;;  %4108 = vmatpush1.msra.mxu0 %v7411_v0 }
 0x4bc   : > { %4141 = vmatprep.mubr.f32.mxu0 %v7843_v55  ;;  %4373 = vmatpush1.msra.mxu1 %v7314_v7 }
 0x4bd   : > { %4144 = vmatmul.mubr.f32.vlgmr.msra.gmra.mxu0 %v3925_v46  ;;  %4259 = vmatprep.subr.mxu0 %v7275_v33 }
 0x4be   : > { %4375 = vmatprep.subr.mxu1 %v7382_v62  ;;  %4263 = vmatpush1.msra.mxu0 %v7300_v4 }
 0x4bf   : > { %4377 = vmatpush1.msra.mxu1 %v7392_v45  ;;  %4410 = vmatprep.mubr.f32.mxu1 %v7843_v55 }
 0x4c0   : > { %4267 = vmatprep.subr.mxu0 %v7309_v29  ;;  %4412 = vmatmul.mubr.f32.vlgmr.msra.gmra.mxu1 %v7543_v52 }
 0x4c1   : > { %4535 = vmatprep.subr.mxu1 %v7356_v63  ;;  %4271 = vmatpush1.msra.mxu0 %v7320_v10 }
 0x4c2   : > { %4541 = vmatpush1.msra.mxu1 %v7373_v28  ;;  %4275 = vmatprep.subr.mxu0 %v7348_v31 }
 0x4c3   : > { %4547 = vmatprep.subr.mxu1 %v7384_v9  ;;  %4279 = vmatpush1.msra.mxu0 %v7337_v56 }
 0x4c4   : > { %4553 = vmatpush1.msra.mxu1 %v7394_v15  ;;  %4283 = vmatprep.subr.mxu0 %v7387_v42 }
 0x4c5   : > { %4559 = vmatprep.subr.mxu1 %v7402_v27  ;;  %4287 = vmatpush1.msra.mxu0 %v7369_v1 }
 0x4c6   : > { %4565 = vmatpush1.msra.mxu1 %v7414_v14  ;;  %4291 = vmatprep.subr.mxu0 %v7420_v30 }
 0x4c7   : > { %4571 = vmatprep.subr.mxu1 %v7425_v17  ;;  %4295 = vmatpush1.msra.mxu0 %v7428_v24 }
 0x4c8   : > { %4328 = vmatprep.mubr.f32.mxu0 %v7843_v55  ;;  %4577 = vmatpush1.msra.mxu1 %v7433_v32 }
 0x4c9   : > { %4330 = vmatmul.mubr.f32.vlgmr.msra.gmra.mxu0 %v7543_v52  ;;  %4445 = vmatprep.subr.mxu0 %v7222_v58 }
 0x4ca   : > { %4583 = vmatprep.subr.mxu1 %v7865_v36  ;;  %4447 = vmatpush1.msra.mxu0 %v7220_v49 }
 0x4cb   : > { %4589 = vmatpush1.msra.mxu1 %v7866_v18  ;;  %4622 = vmatprep.mubr.f32.mxu1 %v7843_v55 }
 0x4cc   : > { %4449 = vmatprep.subr.mxu0 %v7271_v37  ;;  %4624 = vmatmul.mubr.f32.vlgmr.msra.gmra.mxu1 %v7587_v13 }
 0x4cd   : > { %4746 = vmatprep.subr.mxu1 %v7222_v58  ;;  %4451 = vmatpush1.msra.mxu0 %v7248_v44 }
 0x4ce   : > { %4748 = vmatpush1.msra.mxu1 %v7220_v49  ;;  %4453 = vmatprep.subr.mxu0 %v7305_v5 }
 0x4cf   : > { %4750 = vmatprep.subr.mxu1 %v7271_v37  ;;  %4455 = vmatpush1.msra.mxu0 %v7282_v38 }
 0x4d0   : > { %4752 = vmatpush1.msra.mxu1 %v7248_v44  ;;  %4457 = vmatprep.subr.mxu0 %v7342_v57 }
 0x4d1   : > { %4754 = vmatprep.subr.mxu1 %v7305_v5  ;;  %4459 = vmatpush1.msra.mxu0 %v7314_v7 }
 0x4d2   : > { %4756 = vmatpush1.msra.mxu1 %v7282_v38  ;;  %4461 = vmatprep.subr.mxu0 %v7382_v62 }
 0x4d3   : > { %4758 = vmatprep.subr.mxu1 %v7342_v57  ;;  %4463 = vmatpush1.msra.mxu0 %v7392_v45 }
 0x4d4   : > { %4496 = vmatprep.mubr.f32.mxu0 %v7843_v55  ;;  %4760 = vmatpush1.msra.mxu1 %v7314_v7 }
 0x4d5   : > { %4502 = vmatmul.mubr.f32.vlgmr.msra.gmra.mxu0 %v4501_v19  ;;  %4654 = vmatprep.subr.mxu0 %v7867_v23 }
 0x4d6   : > { %4762 = vmatprep.subr.mxu1 %v7382_v62  ;;  %4657 = vmatpush1.msra.mxu0 %v7240_v6 }
 0x4d7   : > { %4764 = vmatpush1.msra.mxu1 %v7392_v45  ;;  %4797 = vmatprep.mubr.f32.mxu1 %v7843_v55 }
 0x4d8   : > { %4660 = vmatprep.subr.mxu0 %v7290_v3  ;;  %4801 = vmatmul.mubr.f32.vlgmr.msra.gmra.mxu1 %v4499_v43 }
 0x4d9   : > { %4932 = vmatprep.subr.mxu1 %v7222_v58  ;;  %4663 = vmatpush1.msra.mxu0 %v7280_v59 }
 0x4da   : > { %4934 = vmatpush1.msra.mxu1 %v7220_v49  ;;  %4666 = vmatprep.subr.mxu0 %v7326_v50 }
 0x4db   : > { %4936 = vmatprep.subr.mxu1 %v7271_v37  ;;  %4669 = vmatpush1.msra.mxu0 %v7297_v47 }
 0x4dc   : > { %4938 = vmatpush1.msra.mxu1 %v7248_v44  ;;  %4672 = vmatprep.subr.mxu0 %v7364_v20 }
 0x4dd   : > { %4940 = vmatprep.subr.mxu1 %v7305_v5  ;;  %4675 = vmatpush1.msra.mxu0 %v7332_v53 }
 0x4de   : > { %4942 = vmatpush1.msra.mxu1 %v7282_v38  ;;  %4678 = vmatprep.subr.mxu0 %v7399_v21 }
 0x4df   : > { %4944 = vmatprep.subr.mxu1 %v7342_v57  ;;  %4681 = vmatpush1.msra.mxu0 %v7411_v0 }
 0x4e0   : > { %4714 = vmatprep.mubr.f32.mxu0 %v7843_v55  ;;  %4946 = vmatpush1.msra.mxu1 %v7314_v7 }
 0x4e1   : > { %4717 = vmatmul.mubr.f32.vlgmr.msra.gmra.mxu0 %v4498_v51  ;;  %4832 = vmatprep.subr.mxu0 %v7275_v33 }
 0x4e2   : > { %4948 = vmatprep.subr.mxu1 %v7382_v62  ;;  %4836 = vmatpush1.msra.mxu0 %v7300_v4 }
 0x4e3   : > { %4950 = vmatpush1.msra.mxu1 %v7392_v45  ;;  %4983 = vmatprep.mubr.f32.mxu1 %v7843_v55 }
 0x4e4   : > { %4840 = vmatprep.subr.mxu0 %v7309_v29  ;;  %4985 = vmatmul.mubr.f32.vlgmr.msra.gmra.mxu1 %v7587_v13 }
 0x4e5   : > { %5113 = vmatprep.subr.mxu1 %v7356_v63  ;;  %4844 = vmatpush1.msra.mxu0 %v7320_v10  ;;  %v5076_v63 = vsub.f32 %v4998_v39, %v7660_v40 }
 0x4e6   : > { %5119 = vmatpush1.msra.mxu1 %v7373_v28  ;;  %4848 = vmatprep.subr.mxu0 %v7348_v31 }
 0x4e7   : > { %5125 = vmatprep.subr.mxu1 %v7384_v9  ;;  %4852 = vmatpush1.msra.mxu0 %v7337_v56  ;;  %v5077_v28 = vand.u32 4294901760, %v5076_v63 }
 0x4e8   : > { %5131 = vmatpush1.msra.mxu1 %v7394_v15  ;;  %4856 = vmatprep.subr.mxu0 %v7387_v42 }
 0x4e9   : > { %5137 = vmatprep.subr.mxu1 %v7402_v27  ;;  %4860 = vmatpush1.msra.mxu0 %v7369_v1  ;;  %v5078_v9 = vsub.f32 %v5076_v63, %v5077_v28 }
 0x4ea   : > { %5143 = vmatpush1.msra.mxu1 %v7414_v14  ;;  %4864 = vmatprep.subr.mxu0 %v7420_v30 }
 0x4eb   : > { %5149 = vmatprep.subr.mxu1 %v7425_v17  ;;  %4868 = vmatpush1.msra.mxu0 %v7428_v24  ;;  %v5079_v15 = vand.u32 4294901760, %v5078_v9 }
 0x4ec   : > { %4901 = vmatprep.mubr.f32.mxu0 %v7843_v55  ;;  %5155 = vmatpush1.msra.mxu1 %v7433_v32 }
 0x4ed   : > { %4903 = vmatmul.mubr.f32.vlgmr.msra.gmra.mxu0 %v7587_v13  ;;  %5023 = vmatprep.subr.mxu0 %v7222_v58 }
 0x4ee   : > { %5161 = vmatprep.subr.mxu1 %v7865_v36  ;;  %5025 = vmatpush1.msra.mxu0 %v7220_v49 }
 0x4ef   : > { %5167 = vmatpush1.msra.mxu1 %v7866_v18  ;;  %5200 = vmatprep.mubr.f32.mxu1 %v7843_v55 }
 0x4f0   : > { %5027 = vmatprep.subr.mxu0 %v7271_v37  ;;  %5202 = vmatmul.mubr.f32.vlgmr.msra.gmra.mxu1 %v7660_v40 }
 0x4f1   : > { %5324 = vmatprep.subr.mxu1 %v7222_v58  ;;  %5029 = vmatpush1.msra.mxu0 %v7248_v44 }
 0x4f2   : > { %5326 = vmatpush1.msra.mxu1 %v7220_v49  ;;  %5031 = vmatprep.subr.mxu0 %v7305_v5 }
 0x4f3   : > { %5328 = vmatprep.subr.mxu1 %v7271_v37  ;;  %5033 = vmatpush1.msra.mxu0 %v7282_v38 }
 0x4f4   : > { %5330 = vmatpush1.msra.mxu1 %v7248_v44  ;;  %5035 = vmatprep.subr.mxu0 %v7342_v57 }
 0x4f5   : > { %5332 = vmatprep.subr.mxu1 %v7305_v5  ;;  %5037 = vmatpush1.msra.mxu0 %v7314_v7 }
 0x4f6   : > { %5334 = vmatpush1.msra.mxu1 %v7282_v38  ;;  %5039 = vmatprep.subr.mxu0 %v7382_v62 }
 0x4f7   : > { %5336 = vmatprep.subr.mxu1 %v7342_v57  ;;  %5041 = vmatpush1.msra.mxu0 %v7392_v45 }
 0x4f8   : > { %5074 = vmatprep.mubr.f32.mxu0 %v7843_v55  ;;  %5338 = vmatpush1.msra.mxu1 %v7314_v7 }
 0x4f9   : > { %5080 = vmatmul.mubr.f32.vlgmr.msra.gmra.mxu0 %v5079_v15  ;;  %5232 = vmatprep.subr.mxu0 %v7867_v23 }
 0x4fa   : > { %5340 = vmatprep.subr.mxu1 %v7382_v62  ;;  %5235 = vmatpush1.msra.mxu0 %v7240_v6 }
 0x4fb   : > { %5342 = vmatpush1.msra.mxu1 %v7392_v45  ;;  %5375 = vmatprep.mubr.f32.mxu1 %v7843_v55 }
 0x4fc   : > { %5238 = vmatprep.subr.mxu0 %v7290_v3  ;;  %5379 = vmatmul.mubr.f32.vlgmr.msra.gmra.mxu1 %v5077_v28 }
 0x4fd   : > { %5510 = vmatprep.subr.mxu1 %v7222_v58  ;;  %5241 = vmatpush1.msra.mxu0 %v7280_v59  ;;  %v3479_v58 = vpop.f32.mrf.mxu1 }
 0x4fe   : > { %5512 = vmatpush1.msra.mxu1 %v7220_v49  ;;  %5244 = vmatprep.subr.mxu0 %v7326_v50 }
 0x4ff   : > { %5514 = vmatprep.subr.mxu1 %v7271_v37  ;;  %5247 = vmatpush1.msra.mxu0 %v7297_v47  ;;  %v3357_v49 = vpop.f32.mrf.mxu0  ;;  %v3481_v37 = vpop.f32.mrf.mxu1 }
 0x500   : > { %5516 = vmatpush1.msra.mxu1 %v7248_v44  ;;  %5250 = vmatprep.subr.mxu0 %v7364_v20  ;;  %v3480_v12 = vadd.f32 %v3479_v58, %v3357_v49 }
 0x501   : > { %5518 = vmatprep.subr.mxu1 %v7305_v5  ;;  %5253 = vmatpush1.msra.mxu0 %v7332_v53  ;;  %v3359_v6 = vpop.f32.mrf.mxu0 }
 0x502   : > { %5520 = vmatpush1.msra.mxu1 %v7282_v38  ;;  %5256 = vmatprep.subr.mxu0 %v7399_v21  ;;  %v3482_v22 = vadd.f32 %v3481_v37, %v3359_v6 }
 0x503   : > { %5522 = vmatprep.subr.mxu1 %v7342_v57  ;;  %5259 = vmatpush1.msra.mxu0 %v7411_v0 }
 0x504   : > { %5292 = vmatprep.mubr.f32.mxu0 %v7843_v55  ;;  %5524 = vmatpush1.msra.mxu1 %v7314_v7 }
 0x505   : > { %5295 = vmatmul.mubr.f32.vlgmr.msra.gmra.mxu0 %v5076_v63  ;;  %5410 = vmatprep.subr.mxu0 %v7275_v33  ;;  %v3656_v33 = vpop.f32.mrf.mxu1 }
 0x506   : > { %5526 = vmatprep.subr.mxu1 %v7382_v62  ;;  %5414 = vmatpush1.msra.mxu0 %v7300_v4 }
 0x507   : > { %5528 = vmatpush1.msra.mxu1 %v7392_v45  ;;  %5561 = vmatprep.mubr.f32.mxu1 %v7843_v55 }
 0x508   : > { %5418 = vmatprep.subr.mxu0 %v7309_v29  ;;  %5563 = vmatmul.mubr.f32.vlgmr.msra.gmra.mxu1 %v7660_v40 }
 0x509   : > { %5422 = vmatpush1.msra.mxu0 %v7320_v10  ;;  %5479 = vmatprep.mubr.f32.mxu0 %v7843_v55  ;;  %v7737_v55 = vpop.f32.mrf.mxu1 }
 0x50a   : > { %5426 = vmatprep.subr.mxu0 %v7348_v31  ;;  %v3572_v44 = vpop.f32.mrf.mxu0 }
 0x50b   : > { %5430 = vmatpush1.msra.mxu0 %v7337_v56  ;;  %v3573_v13 = vadd.f32 %v3572_v44, %v3480_v12 }
 0x50c   : > { %5434 = vmatprep.subr.mxu0 %v7387_v42  ;;  %v3574_v59 = vpop.f32.mrf.mxu0 }
 0x50d   : > { %5438 = vmatpush1.msra.mxu0 %v7369_v1  ;;  %v7739_v3 = vpop.f32.mrf.mxu1  ;;  %v3575_v28 = vadd.f32 %v3574_v59, %v3482_v22 }
 0x50e   : > { %5442 = vmatprep.subr.mxu0 %v7420_v30 }
 0x50f   : > { %5446 = vmatpush1.msra.mxu0 %v7428_v24  ;;  %v7743_v5 = vpop.f32.mrf.mxu1  ;;  %v3659_v6 = vadd.f32 %v7737_v55, %v3575_v28 }
 0x510   : > { %5481 = vmatmul.mubr.f32.vlgmr.msra.gmra.mxu0 %v7660_v40 }
 0x516   : > { %v3758_v38 = vpop.f32.mrf.mxu0 }
 0x518   : > { %v7741_v47 = vpop.f32.mrf.mxu0 }
 0x56a   : > { %v4052_v29 = vpop.f32.mrf.mxu1 }
 0x56c   : > { %v4054_v50 = vpop.f32.mrf.mxu1 }
 0x572   : > { %v3930_v4 = vpop.f32.mrf.mxu0 }
 0x573   : > { %v4053_v48 = vadd.f32 %v4052_v29, %v3930_v4  ;;  %v3657_v29 = vadd.f32 %v3656_v33, %v3573_v13 }
 0x574   : > { %v3932_v7 = vpop.f32.mrf.mxu0  ;;  %v4229_v53 = vpop.f32.mrf.mxu1 }
 0x575   : > { %v4055_v18 = vadd.f32 %v4054_v50, %v3932_v7 }
 0x576   : > { %v4231_v31 = vpop.f32.mrf.mxu1 }
 0x57d   : > { %v4145_v10 = vpop.f32.mrf.mxu0 }
 0x57e   : > { %v4146_v23 = vadd.f32 %v4145_v10, %v4053_v48  ;;  %v3759_v10 = vadd.f32 %v3758_v38, %v3657_v29 }
 0x57f   : > { %v4147_v56 = vpop.f32.mrf.mxu0 }
 0x580   : > { %v4413_v20 = vpop.f32.mrf.mxu1  ;;  %v4148_v2 = vadd.f32 %v4147_v56, %v4055_v18  ;;  %v4230_v41 = vadd.f32 %v4229_v53, %v4146_v23  ;;  %v3841_v33 = vadd.f32 %v7739_v3, %v3759_v10 }
 0x582   : > { %v4415_v42 = vpop.f32.mrf.mxu1  ;;  %v4232_v60 = vadd.f32 %v4231_v31, %v4148_v2 }
 0x589   : > { %v4331_v57 = vpop.f32.mrf.mxu0 }
 0x58a   : > { %v4332_v19 = vadd.f32 %v4331_v57, %v4230_v41 }
 0x58b   : > { %v4333_v1 = vpop.f32.mrf.mxu0 }
 0x58c   : > { %v4625_v45 = vpop.f32.mrf.mxu1  ;;  %v4334_v9 = vadd.f32 %v4333_v1, %v4232_v60  ;;  %v4414_v58 = vadd.f32 %v4413_v20, %v4332_v19 }
 0x58e   : > { %v4627_v0 = vpop.f32.mrf.mxu1  ;;  %v4416_v37 = vadd.f32 %v4415_v42, %v4334_v9  ;;  %v5574_v59 = vrot.slane %v4414_v58, 7 }
 0x590   : > { %v5575_v38 = vrot.slane %v4416_v37, 7 }
 0x595   : > { %v4503_v62 = vpop.f32.mrf.mxu0 }
 0x596   : > { %v4626_v25 = vadd.f32 %v4625_v45, %v4503_v62  ;;  %v3761_v62 = vadd.f32 %v7741_v47, %v3659_v6 }
 0x597   : > { %v4505_v21 = vpop.f32.mrf.mxu0 }
 0x598   : > { %v4802_v14 = vpop.f32.mrf.mxu1  ;;  %v4628_v61 = vadd.f32 %v4627_v0, %v4505_v21  ;;  %v3843_v47 = vadd.f32 %v7743_v5, %v3761_v62 }
 0x59a   : > { %v4804_v24 = vpop.f32.mrf.mxu1 }
 0x5a1   : > { %v4718_v27 = vpop.f32.mrf.mxu0 }
 0x5a2   : > { %v4719_v16 = vadd.f32 %v4718_v27, %v4626_v25 }
 0x5a3   : > { %v4720_v30 = vpop.f32.mrf.mxu0 }
 0x5a4   : > { %v4986_v32 = vpop.f32.mrf.mxu1  ;;  %v4721_v8 = vadd.f32 %v4720_v30, %v4628_v61  ;;  %v4803_v51 = vadd.f32 %v4802_v14, %v4719_v16  ;;  %v5591_v14 = vsel %vm5590_vm1, %v3841_v33, %v5574_v59 }
 0x5a6   : > { %v4988_v36 = vpop.f32.mrf.mxu1  ;;  %v4805_v39 = vadd.f32 %v4804_v24, %v4721_v8  ;;  %v5592_v24 = vsel %vm5590_vm1, %v3843_v47, %v5575_v38 }
 0x5ad   : > { %v4904_v17 = vpop.f32.mrf.mxu0 }
 0x5ae   : > { %v4905_v34 = vadd.f32 %v4904_v17, %v4803_v51 }
 0x5af   : > { %v4906_v11 = vpop.f32.mrf.mxu0 }
 0x5b0   : > { %v5203_v52 = vpop.f32.mrf.mxu1  ;;  %v4907_v49 = vadd.f32 %v4906_v11, %v4805_v39  ;;  %v4987_v44 = vadd.f32 %v4986_v32, %v4905_v34 }
 0x5b2   : > { %v5205_v43 = vpop.f32.mrf.mxu1  ;;  %v4989_v56 = vadd.f32 %v4988_v36, %v4907_v49  ;;  %v5580_v20 = vrot.slane %v4987_v44, 6 }
 0x5b4   : > { %v5581_v27 = vrot.slane %v4989_v56, 6  ;;  %v5594_v17 = vsel %vm5593_vm2, %v5591_v14, %v5580_v20 }
 0x5b9   : > { %v5081_v26 = vpop.f32.mrf.mxu0 }
 0x5ba   : > { %v5204_v35 = vadd.f32 %v5203_v52, %v5081_v26  ;;  %v5595_v26 = vsel %vm5593_vm2, %v5592_v24, %v5581_v27 }
 0x5bb   : > { %v5083_v46 = vpop.f32.mrf.mxu0 }
 0x5bc   : > { %v5380_v40 = vpop.f32.mrf.mxu1  ;;  %v5206_v15 = vadd.f32 %v5205_v43, %v5083_v46 }
 0x5be   : > { %v5382_v50 = vpop.f32.mrf.mxu1 }
 0x5c5   : > { %v5296_v54 = vpop.f32.mrf.mxu0 }
 0x5c6   : > { %v5297_v4 = vadd.f32 %v5296_v54, %v5204_v35 }
 0x5c7   : > { %v5298_v63 = vpop.f32.mrf.mxu0 }
 0x5c8   : > { %v5299_v7 = vadd.f32 %v5298_v63, %v5206_v15  ;;  %v5381_v53 = vadd.f32 %v5380_v40, %v5297_v4  ;;  %v5564_v57 = vpop.f32.mrf.mxu1 }
 0x5ca   : > { %v5383_v45 = vadd.f32 %v5382_v50, %v5299_v7  ;;  %v5566_v0 = vpop.f32.mrf.mxu1 }
 0x5d0   : > { %v5482_v31 = vpop.f32.mrf.mxu0 }
 0x5d1   : > { %v5483_v1 = vadd.f32 %v5482_v31, %v5381_v53 }
 0x5d2   : > { %v5484_v21 = vpop.f32.mrf.mxu0 }
 0x5d3   : > { %v5565_v55 = vadd.f32 %v5564_v57, %v5483_v1  ;;  %v5485_v42 = vadd.f32 %v5484_v21, %v5383_v45 }
 0x5d5   : > { %v5586_v30 = vrot.slane %v5565_v55, 5  ;;  %v5567_v3 = vadd.f32 %v5566_v0, %v5485_v42 }
 0x5d7   : > { %v5597_v32 = vsel %vm5596_vm3, %v5594_v17, %v5586_v30  ;;  %v5587_v11 = vrot.slane %v5567_v3, 5 }
 0x5d8   : > { %v5601_v48 = vrot.slane %v5597_v32, 4 }
 0x5d9   : > { %v5598_v25 = vsel %vm5596_vm3, %v5595_v26, %v5587_v11 }
 0x5da   : > { %5605 = vst [vmem:[%s6801_s16] sm:$0xf0] %v5601_v48  ;;  %v5602_v36 = vrot.slane %v5598_v25, 4 }
 0x5dc   : > { %5606 = vst [vmem:[%s6801_s16 + $0x8] sm:$0xf0] %v5602_v36 }
 0x5dd   : > { %6203 = shalt.err (!%p6200_p10)
}
 0x5de   : > { %s6204_s15 = scalar_lea.hbm %s5620_s9, 256  ;;  %s6208_s17 = scalar_lea.hbm %s7794_s5, 512 }
 0x5df   : > { %p6205_p13 = scmp.ne.s32.totalorder %s5620_s9, %s6204_s15  ;;  %p6209_p2 = scmp.lt.s32.totalorder %s5620_s9, %s7794_s5 }
 0x5e0   : > { %p6210_p4 = scmp.lt.s32.totalorder %s6208_s17, %s6204_s15 }
 0x5e1   : > { %p6206_p1 = pnand %p6205_p13, %p7868_p0 }
 0x5e2   : > { %p6211_p6 = por %p6210_p4, %p6209_p2 }
 0x5e3   : > { %p6207_p11 = pneg %p6206_p1 }
 0x5e5   : > { %p6212_p12 = pnand %p6211_p6, %p6207_p11 }
 0x5e7   : > { %6215 = shalt.err (!%p6212_p12)
}
 0x5e8   : > { %5971 = dma.vmem_to_hbm [thread:$0]  (%p7868_p0), %s5623_s24, 256, %s5620_s9, %s5608_s11  }
 0x5e9 PF: > { %s5634_s23 = sand.u32 1, %s6254_s18   ;;  %p7869_p5 = scmp.ne.s32.totalorder %s7826_s25, 0 }
 0x5ea   : > { %p7870_p3 = scmp.ge.s32.totalorder %s6266_s21, 2  ;;  %s5635_s12 = scalar_lea.sflag [#allocation4], %s5634_s23 }
 0x5ec   : > { %p5991_p7 = pnand %p7870_p3, %p7869_p5 }
 0x5ee   : > { %p5992_p9 = pneg %p5991_p7 }
 0x5f0   : > { %6249 = dma.done.wait (%p5992_p9), %s5635_s12, 256  }
 0x5f1   : > { %6251 = vsyncadd (%p5992_p9), %s5635_s12, 4294967040  ;;  %p22_p8 = scmp.ge.s32.totalorder %s6402_s6, 4   ;;  %s7871_s18 = smov %s6258_s19 }
 0x5f2   : > { %s7872_s19 = smov %s6262_s20  ;;  %s7873_s20 = smov %s6412_s10 }
 0x5f3   : > { %s7874_s21 = smov %s6402_s6  ;;  %24 = sbr.rel (!%p22_p8) target bundleno = 8 (0x8), region = 112 }
 0x5f8   :  { %5640 = vsyncpa [#allocation3], 1 }
 0x5f9   :  { %5642 = vsyncpa [#allocation3 + $0x1], 1 }
 0x5fa   :  { %5643 = vsyncpa [#allocation6], 1 }
 0x5fb   :  { %5645 = vsyncpa [#allocation6 + $0x1], 1 }
 0x5fc   :  { %5646 = vsyncpa [#allocation9], 1 }
 0x5fd   :  { %5647 = vsyncpa [#allocation4], 1 }
 0x5fe   :  { %5649 = vsyncpa [#allocation4 + $0x1], 1 }

</bundles_post_ra>
